<compile_context>
chip_gen: v7x
topology: tpu7x:2x2x1
jax: 0.10.0
libtpu: 0.0.40
codegen_flags: <defaults>
</compile_context>

<pallas_src>
import math

import jax
import jax.numpy as jnp
from jax.experimental import pallas as pl
from jax.experimental.pallas import tpu as pltpu

# ----------------------------- model config ---------------------------------
BATCH = 2
SEQ = 8
HIDDEN = 32
NUM_HEADS = 4
HEAD_DIM = HIDDEN // NUM_HEADS
INTERMEDIATE = 64
LN_EPS = 1e-12


def _gelu(x):
    # TODO(synk): nlpcol's get_activation("gelu") may be exact erf-GELU; using the
    # tanh approximation (original BERT formulation) for robust TPU lowering.
    c = math.sqrt(2.0 / math.pi)
    return 0.5 * x * (1.0 + jnp.tanh(c * (x + 0.044715 * x * x * x)))


def _layer_norm(x, gamma, beta, eps):
    # x: (N, H); gamma/beta: (1, H); normalize over last axis (population var).
    mean = jnp.mean(x, axis=-1, keepdims=True)
    var = jnp.mean((x - mean) * (x - mean), axis=-1, keepdims=True)
    inv = jax.lax.rsqrt(var + eps)
    return (x - mean) * inv * gamma + beta


# ------------------------------- kernel --------------------------------------
def bert_layer_kernel(
    x_ref,        # (B*L, H)   f32
    mask_ref,     # (B, 1, L)  f32
    w_ref,        # (3H+I, 3H) bf16  packed [Wqkv ; W1 ; W2 ; Wo] (lane-padded)
    vec_ref,      # (8, 3H)    f32   packed biases / LN params
    out_ref,      # (B*L, H)   f32
):
    x = x_ref[...]                      # (BL, H) f32
    mask = mask_ref[...]                # (B, 1, L)
    w = w_ref[...]                      # (160, 96) bf16
    vecs = vec_ref[...]                 # (8, 96) f32

    n_batch, _, seq = mask_ref.shape
    n_rows, hid = x_ref.shape
    nh, hd, inter = NUM_HEADS, HEAD_DIM, INTERMEDIATE

    # ---- unpack the weight slab (sublane slices; bf16 for MXU operands) ------
    wqkv = w[0:hid, :]                          # (H, 3H)
    w1   = w[hid:2 * hid, :]                    # (H, 3H)  cols [0,I) valid
    w2   = w[2 * hid:2 * hid + inter, :]        # (I, 3H)  cols [0,H) valid
    wo   = w[2 * hid + inter:3 * hid + inter, :]  # (H, 3H)  cols [0,H) valid

    # ---- unpack the small-vector slab ----------------------------------------
    bqkv = vecs[0:1, :]                 # (1, 3H)  (bq already scaled by 1/sqrt(D))
    bo   = vecs[1:2, :hid]
    g1   = vecs[2:3, :hid]
    be1  = vecs[3:4, :hid]
    b1   = vecs[4:5, :inter]
    b2   = vecs[5:6, :hid]
    g2   = vecs[6:7, :hid]
    be2  = vecs[7:8, :hid]

    xb = x.astype(jnp.bfloat16)

    # ---- fused Q/K/V projection: ONE lane-dense matmul -----------------------
    qkv = jnp.dot(xb, wqkv, preferred_element_type=jnp.float32) + bqkv   # (BL, 3H)
    q2 = qkv[:, 0:hid]
    k2 = qkv[:, hid:2 * hid]
    v2 = qkv[:, 2 * hid:3 * hid]

    # Pre-transpose K once (single XLU transpose) so scores are NN matmuls.
    kT2 = jnp.transpose(k2)             # (H, BL) f32

    # Per-(batch, head) tiles stacked on a leading axis (static slices only);
    # batch is folded into the head axis so softmax runs over one slab.
    q3 = jnp.stack(
        [q2[b * seq:(b + 1) * seq, h * hd:(h + 1) * hd]
         for b in range(n_batch) for h in range(nh)], axis=0).astype(jnp.bfloat16)
    kT3 = jnp.stack(
        [kT2[h * hd:(h + 1) * hd, b * seq:(b + 1) * seq]
         for b in range(n_batch) for h in range(nh)], axis=0).astype(jnp.bfloat16)
    v3 = jnp.stack(
        [v2[b * seq:(b + 1) * seq, h * hd:(h + 1) * hd]
         for b in range(n_batch) for h in range(nh)], axis=0).astype(jnp.bfloat16)

    # scores (1/sqrt(D) folded into Wq), mask, softmax — all over (B*NH, L, L)
    s = jnp.einsum("zld,zdm->zlm", q3, kT3,
                   preferred_element_type=jnp.float32)                  # (Z, L, L)
    neg = (1.0 - mask) * -10000.0                                       # (B, 1, L)
    negz = jnp.concatenate(
        [neg[b:b + 1] for b in range(n_batch) for _ in range(nh)], axis=0)  # (Z,1,L)
    s = s + negz
    s = s - jnp.max(s, axis=-1, keepdims=True)
    p = jnp.exp(s)
    p = p * pl.reciprocal(jnp.sum(p, axis=-1, keepdims=True), approx=True)
    # attention-prob dropout is identity in eval mode

    ctx = jnp.einsum("zlm,zmd->zld", p.astype(jnp.bfloat16), v3,
                     preferred_element_type=jnp.float32)                # (Z, L, D)

    # ---- merge heads -> (BL, H), then ONE output-projection matmul -----------
    ctx2 = jnp.concatenate(
        [jnp.concatenate([ctx[b * nh + h] for h in range(nh)], axis=1)
         for b in range(n_batch)], axis=0)                              # (BL, H)
    attn = jnp.dot(ctx2.astype(jnp.bfloat16), wo,
                   preferred_element_type=jnp.float32)[:, :hid] + bo    # (BL, H)

    # --- AttentionOutput: dense -> (drop) -> add -> LayerNorm ------------------
    attn_out = _layer_norm(attn + x, g1, be1, LN_EPS)

    # --- FeedForward: dense -> gelu --------------------------------------------
    ff = jnp.dot(attn_out.astype(jnp.bfloat16), w1,
                 preferred_element_type=jnp.float32)[:, :inter] + b1
    ff = _gelu(ff)

    # --- FFNOutput: dense -> (drop) -> add -> LayerNorm ------------------------
    ff2 = jnp.dot(ff.astype(jnp.bfloat16), w2,
                  preferred_element_type=jnp.float32)[:, :hid] + b2
    out = _layer_norm(ff2 + attn_out, g2, be2, LN_EPS)

    out_ref[...] = out.astype(out_ref.dtype)


# --------------------------- one-time param prep ------------------------------
def prepare_params(params):
    """Hoisted out of the per-call path: pack weights/biases once."""
    H, I, D = HIDDEN, INTERMEDIATE, HEAD_DIM
    w3 = 3 * H
    scale = 1.0 / math.sqrt(D)

    wqkv = jnp.concatenate(
        [params["wq"] * scale, params["wk"], params["wv"]], axis=1)      # (H, 3H)
    bqkv = jnp.concatenate(
        [params["bq"].reshape(1, H) * scale,
         params["bk"].reshape(1, H),
         params["bv"].reshape(1, H)], axis=1)                            # (1, 3H)

    def pad_cols(m):
        m = m.astype(jnp.float32)
        return jnp.pad(m, ((0, 0), (0, w3 - m.shape[1])))

    # Weight slab (3H+I, 3H) = (160, 96): rows [Wqkv | W1 | W2 | Wo], bf16.
    wslab = jnp.concatenate(
        [pad_cols(wqkv), pad_cols(params["w_ff1"]),
         pad_cols(params["w_ff2"]), pad_cols(params["wo"])],
        axis=0).astype(jnp.bfloat16)

    def row(v):
        v = v.reshape(1, -1).astype(jnp.float32)
        return jnp.pad(v, ((0, 0), (0, w3 - v.shape[1])))

    vecs = jnp.concatenate(
        [row(bqkv), row(params["bo"]), row(params["ln1_g"]), row(params["ln1_b"]),
         row(params["b_ff1"]), row(params["b_ff2"]),
         row(params["ln2_g"]), row(params["ln2_b"])],
        axis=0)                                                          # (8, 3H) f32

    return {"wslab": wslab, "vecs": vecs}


# ------------------------------- wrapper --------------------------------------
def _full_spec(shape):
    zeros = (0,) * len(shape)
    return pl.BlockSpec(shape, lambda i, z=zeros: z)


def bert_layer(hidden_states, attention_mask, prep):
    """hidden_states: [B, L, H] f32; attention_mask: [B, 1, 1, L] f32."""
    B, L, H = hidden_states.shape
    I = INTERMEDIATE
    NH, D = NUM_HEADS, HEAD_DIM

    x2d = hidden_states.reshape(B * L, H).astype(jnp.float32)
    mask = attention_mask.reshape(B, 1, L).astype(jnp.float32)
    wslab, vecs = prep["wslab"], prep["vecs"]

    flops = 2 * (B * L * H * 3 * H            # QKV projection
                 + 2 * B * NH * L * L * D     # scores + ctx
                 + B * L * H * H              # output projection
                 + B * L * H * I              # FFN up
                 + B * L * I * H)             # FFN down
    transcendentals = B * NH * L * L + B * L * I
    bytes_accessed = (x2d.size * 4 + mask.size * 4 + wslab.size * 2
                      + vecs.size * 4 + B * L * H * 4)

    in_arrays = [x2d, mask, wslab, vecs]
    out2d = pl.pallas_call(
        bert_layer_kernel,
        out_shape=jax.ShapeDtypeStruct((B * L, H), jnp.float32),
        grid_spec=pltpu.PrefetchScalarGridSpec(
            num_scalar_prefetch=0,
            grid=(1,),                                   # everything resident in VMEM
            in_specs=[_full_spec(a.shape) for a in in_arrays],
            out_specs=_full_spec((B * L, H)),
        ),
        compiler_params=pltpu.CompilerParams(
            dimension_semantics=("arbitrary",),
        ),
        cost_estimate=pl.CostEstimate(
            flops=flops, transcendentals=transcendentals,
            bytes_accessed=bytes_accessed),
    )(*in_arrays)

    return out2d.reshape(B, L, H)


# --------------------------- plain-JAX reference -------------------------------
def bert_layer_ref(x, attention_mask, p):
    B, L, H = x.shape
    mask = attention_mask.reshape(B, 1, 1, L)
    q = x @ p["wq"] + p["bq"]
    k = x @ p["wk"] + p["bk"]
    v = x @ p["wv"] + p["bv"]

    def split(t):
        return t.reshape(B, L, NUM_HEADS, HEAD_DIM).transpose(0, 2, 1, 3)

    qh, kh, vh = split(q), split(k), split(v)
    scores = jnp.einsum("bhld,bhmd->bhlm", qh, kh) / math.sqrt(HEAD_DIM)
    scores = scores + (1.0 - mask) * -10000.0
    probs = jax.nn.softmax(scores, axis=-1)
    ctx = jnp.einsum("bhlm,bhmd->bhld", probs, vh)
    ctx = ctx.transpose(0, 2, 1, 3).reshape(B, L, H)

    def ln(t, g, b):
        m = jnp.mean(t, axis=-1, keepdims=True)
        var = jnp.mean((t - m) ** 2, axis=-1, keepdims=True)
        return (t - m) * jax.lax.rsqrt(var + LN_EPS) * g + b

    attn = ctx @ p["wo"] + p["bo"]
    attn_out = ln(attn + x, p["ln1_g"], p["ln1_b"])
    ff = _gelu(attn_out @ p["w_ff1"] + p["b_ff1"])
    ff2 = ff @ p["w_ff2"] + p["b_ff2"]
    return ln(ff2 + attn_out, p["ln2_g"], p["ln2_b"])


# ----------------------------------- main --------------------------------------
def _init_params(key):
    ks = jax.random.split(key, 8)
    std = 0.02
    p = {
        "wq": jax.random.normal(ks[0], (HIDDEN, HIDDEN), jnp.float32) * std,
        "wk": jax.random.normal(ks[1], (HIDDEN, HIDDEN), jnp.float32) * std,
        "wv": jax.random.normal(ks[2], (HIDDEN, HIDDEN), jnp.float32) * std,
        "wo": jax.random.normal(ks[3], (HIDDEN, HIDDEN), jnp.float32) * std,
        "w_ff1": jax.random.normal(ks[4], (HIDDEN, INTERMEDIATE), jnp.float32) * std,
        "w_ff2": jax.random.normal(ks[5], (INTERMEDIATE, HIDDEN), jnp.float32) * std,
        "bq": jnp.zeros((1, HIDDEN), jnp.float32),
        "bk": jnp.full((1, HIDDEN), 0.01, jnp.float32),
        "bv": jnp.full((1, HIDDEN), -0.01, jnp.float32),
        "bo": jnp.zeros((1, HIDDEN), jnp.float32),
        "b_ff1": jnp.full((1, INTERMEDIATE), 0.02, jnp.float32),
        "b_ff2": jnp.zeros((1, HIDDEN), jnp.float32),
        "ln1_g": jnp.ones((1, HIDDEN), jnp.float32),
        "ln1_b": jnp.zeros((1, HIDDEN), jnp.float32),
        "ln2_g": jnp.ones((1, HIDDEN), jnp.float32),
        "ln2_b": jnp.zeros((1, HIDDEN), jnp.float32),
    }
    return p


if __name__ == "__main__":
    key = jax.random.PRNGKey(0)
    k_x, k_p = jax.random.split(key)

    hidden_states = jax.random.normal(k_x, (BATCH, SEQ, HIDDEN), jnp.float32)
    # attention mask [B, 1, 1, L]: last two tokens of batch 1 are padding.
    attention_mask = jnp.ones((BATCH, 1, 1, SEQ), jnp.float32)
    attention_mask = attention_mask.at[1, 0, 0, -2:].set(0.0)

    params = _init_params(k_p)
    prep = prepare_params(params)          # one-time packing, outside the hot path

    out = bert_layer(hidden_states, attention_mask, prep)
    out = jax.block_until_ready(out)

    ref = bert_layer_ref(hidden_states, attention_mask, params)
    assert out.shape == (BATCH, SEQ, HIDDEN)
    # Tolerance reflects bf16 MXU operands (f32 accumulation & f32 elementwise).
    assert jnp.allclose(out, ref, atol=1e-2, rtol=1e-2), "mismatch vs JAX reference"

    print("KERNEL_OK")
</pallas_src>

<mosaic_0001>
module attributes {stable_mosaic.version = 11 : i64} {
  func.func @bert_layer_kernel(%arg0: i32, %arg1: memref<16x32xf32, #tpu.memory_space<vmem>>, %arg2: memref<2x1x8xf32, #tpu.memory_space<vmem>>, %arg3: memref<160x96xbf16, #tpu.memory_space<vmem>>, %arg4: memref<8x96xf32, #tpu.memory_space<vmem>>, %arg5: memref<16x32xf32, #tpu.memory_space<vmem>>) attributes {dimension_semantics = [#tpu.dimension_semantics<arbitrary>], iteration_bounds = array<i64: 1>, scalar_prefetch = 0 : i64, scratch_operands = 0 : i64, tpu.core_type = #tpu.core_type<tc>, window_params = [{pipeline_mode = #tpu.pipeline_mode<synchronous>, transform_indices = @transform_0, window_bounds = array<i64: 16, 32>}, {pipeline_mode = #tpu.pipeline_mode<synchronous>, transform_indices = @transform_1, window_bounds = array<i64: 2, 1, 8>}, {pipeline_mode = #tpu.pipeline_mode<synchronous>, transform_indices = @transform_2, window_bounds = array<i64: 160, 96>}, {pipeline_mode = #tpu.pipeline_mode<synchronous>, transform_indices = @transform_3, window_bounds = array<i64: 8, 96>}, {pipeline_mode = #tpu.pipeline_mode<synchronous>, transform_indices = @transform_4, window_bounds = array<i64: 16, 32>}]} {
    %c0 = arith.constant 0 : index
    %c0_0 = arith.constant 0 : index
    %0 = vector.load %arg1[%c0, %c0_0] : memref<16x32xf32, #tpu.memory_space<vmem>>, vector<16x32xf32>
    %c0_1 = arith.constant 0 : index
    %c0_2 = arith.constant 0 : index
    %c0_3 = arith.constant 0 : index
    %1 = vector.load %arg2[%c0_1, %c0_2, %c0_3] : memref<2x1x8xf32, #tpu.memory_space<vmem>>, vector<2x1x8xf32>
    %c0_4 = arith.constant 0 : index
    %c0_5 = arith.constant 0 : index
    %2 = vector.load %arg3[%c0_4, %c0_5] : memref<160x96xbf16, #tpu.memory_space<vmem>>, vector<160x96xbf16>
    %c0_6 = arith.constant 0 : index
    %c0_7 = arith.constant 0 : index
    %3 = vector.load %arg4[%c0_6, %c0_7] : memref<8x96xf32, #tpu.memory_space<vmem>>, vector<8x96xf32>
    %4 = vector.extract_strided_slice %2 {offsets = [0, 0], sizes = [32, 96], strides = [1, 1]} : vector<160x96xbf16> to vector<32x96xbf16>
    %5 = vector.extract_strided_slice %2 {offsets = [32, 0], sizes = [32, 96], strides = [1, 1]} : vector<160x96xbf16> to vector<32x96xbf16>
    %6 = vector.extract_strided_slice %2 {offsets = [64, 0], sizes = [64, 96], strides = [1, 1]} : vector<160x96xbf16> to vector<64x96xbf16>
    %7 = vector.extract_strided_slice %2 {offsets = [128, 0], sizes = [32, 96], strides = [1, 1]} : vector<160x96xbf16> to vector<32x96xbf16>
    %8 = vector.extract_strided_slice %3 {offsets = [0, 0], sizes = [1, 96], strides = [1, 1]} : vector<8x96xf32> to vector<1x96xf32>
    %9 = vector.extract_strided_slice %3 {offsets = [1, 0], sizes = [1, 32], strides = [1, 1]} : vector<8x96xf32> to vector<1x32xf32>
    %10 = vector.extract_strided_slice %3 {offsets = [2, 0], sizes = [1, 32], strides = [1, 1]} : vector<8x96xf32> to vector<1x32xf32>
    %11 = vector.extract_strided_slice %3 {offsets = [3, 0], sizes = [1, 32], strides = [1, 1]} : vector<8x96xf32> to vector<1x32xf32>
    %12 = vector.extract_strided_slice %3 {offsets = [4, 0], sizes = [1, 64], strides = [1, 1]} : vector<8x96xf32> to vector<1x64xf32>
    %13 = vector.extract_strided_slice %3 {offsets = [5, 0], sizes = [1, 32], strides = [1, 1]} : vector<8x96xf32> to vector<1x32xf32>
    %14 = vector.extract_strided_slice %3 {offsets = [6, 0], sizes = [1, 32], strides = [1, 1]} : vector<8x96xf32> to vector<1x32xf32>
    %15 = vector.extract_strided_slice %3 {offsets = [7, 0], sizes = [1, 32], strides = [1, 1]} : vector<8x96xf32> to vector<1x32xf32>
    %16 = arith.truncf %0 : vector<16x32xf32> to vector<16x32xbf16>
    %cst = arith.constant dense<0.000000e+00> : vector<16x96xf32>
    %17 = tpu.matmul %16, %4, %cst {dimension_numbers = #tpu.dot_dimension_numbers<[1], [0], [0], [1], [0, 0, 1, 1], [], []>} : vector<16x32xbf16>, vector<32x96xbf16>, vector<16x96xf32> -> vector<16x96xf32>
    %18 = vector.broadcast %8 : vector<1x96xf32> to vector<16x96xf32>
    %19 = arith.addf %17, %18 : vector<16x96xf32>
    %20 = vector.extract_strided_slice %19 {offsets = [0, 0], sizes = [16, 32], strides = [1, 1]} : vector<16x96xf32> to vector<16x32xf32>
    %21 = vector.extract_strided_slice %19 {offsets = [0, 32], sizes = [16, 32], strides = [1, 1]} : vector<16x96xf32> to vector<16x32xf32>
    %22 = vector.extract_strided_slice %19 {offsets = [0, 64], sizes = [16, 32], strides = [1, 1]} : vector<16x96xf32> to vector<16x32xf32>
    %23 = tpu.transpose %21, [1, 0] : vector<16x32xf32> -> vector<32x16xf32>
    %24 = vector.extract_strided_slice %20 {offsets = [0, 0], sizes = [8, 8], strides = [1, 1]} : vector<16x32xf32> to vector<8x8xf32>
    %25 = vector.extract_strided_slice %20 {offsets = [0, 8], sizes = [8, 8], strides = [1, 1]} : vector<16x32xf32> to vector<8x8xf32>
    %26 = vector.extract_strided_slice %20 {offsets = [0, 16], sizes = [8, 8], strides = [1, 1]} : vector<16x32xf32> to vector<8x8xf32>
    %27 = vector.extract_strided_slice %20 {offsets = [0, 24], sizes = [8, 8], strides = [1, 1]} : vector<16x32xf32> to vector<8x8xf32>
    %28 = vector.extract_strided_slice %20 {offsets = [8, 0], sizes = [8, 8], strides = [1, 1]} : vector<16x32xf32> to vector<8x8xf32>
    %29 = vector.extract_strided_slice %20 {offsets = [8, 8], sizes = [8, 8], strides = [1, 1]} : vector<16x32xf32> to vector<8x8xf32>
    %30 = vector.extract_strided_slice %20 {offsets = [8, 16], sizes = [8, 8], strides = [1, 1]} : vector<16x32xf32> to vector<8x8xf32>
    %31 = vector.extract_strided_slice %20 {offsets = [8, 24], sizes = [8, 8], strides = [1, 1]} : vector<16x32xf32> to vector<8x8xf32>
    %32 = vector.shape_cast %24 : vector<8x8xf32> to vector<1x8x8xf32>
    %33 = vector.shape_cast %25 : vector<8x8xf32> to vector<1x8x8xf32>
    %34 = vector.shape_cast %26 : vector<8x8xf32> to vector<1x8x8xf32>
    %35 = vector.shape_cast %27 : vector<8x8xf32> to vector<1x8x8xf32>
    %36 = vector.shape_cast %28 : vector<8x8xf32> to vector<1x8x8xf32>
    %37 = vector.shape_cast %29 : vector<8x8xf32> to vector<1x8x8xf32>
    %38 = vector.shape_cast %30 : vector<8x8xf32> to vector<1x8x8xf32>
    %39 = vector.shape_cast %31 : vector<8x8xf32> to vector<1x8x8xf32>
    %40 = tpu.concatenate %32, %33, %34, %35, %36, %37, %38, %39 in 0 : vector<1x8x8xf32>, vector<1x8x8xf32>, vector<1x8x8xf32>, vector<1x8x8xf32>, vector<1x8x8xf32>, vector<1x8x8xf32>, vector<1x8x8xf32>, vector<1x8x8xf32> -> vector<8x8x8xf32>
    %41 = arith.truncf %40 : vector<8x8x8xf32> to vector<8x8x8xbf16>
    %42 = vector.extract_strided_slice %23 {offsets = [0, 0], sizes = [8, 8], strides = [1, 1]} : vector<32x16xf32> to vector<8x8xf32>
    %43 = vector.extract_strided_slice %23 {offsets = [8, 0], sizes = [8, 8], strides = [1, 1]} : vector<32x16xf32> to vector<8x8xf32>
    %44 = vector.extract_strided_slice %23 {offsets = [16, 0], sizes = [8, 8], strides = [1, 1]} : vector<32x16xf32> to vector<8x8xf32>
    %45 = vector.extract_strided_slice %23 {offsets = [24, 0], sizes = [8, 8], strides = [1, 1]} : vector<32x16xf32> to vector<8x8xf32>
    %46 = vector.extract_strided_slice %23 {offsets = [0, 8], sizes = [8, 8], strides = [1, 1]} : vector<32x16xf32> to vector<8x8xf32>
    %47 = vector.extract_strided_slice %23 {offsets = [8, 8], sizes = [8, 8], strides = [1, 1]} : vector<32x16xf32> to vector<8x8xf32>
    %48 = vector.extract_strided_slice %23 {offsets = [16, 8], sizes = [8, 8], strides = [1, 1]} : vector<32x16xf32> to vector<8x8xf32>
    %49 = vector.extract_strided_slice %23 {offsets = [24, 8], sizes = [8, 8], strides = [1, 1]} : vector<32x16xf32> to vector<8x8xf32>
    %50 = vector.shape_cast %42 : vector<8x8xf32> to vector<1x8x8xf32>
    %51 = vector.shape_cast %43 : vector<8x8xf32> to vector<1x8x8xf32>
    %52 = vector.shape_cast %44 : vector<8x8xf32> to vector<1x8x8xf32>
    %53 = vector.shape_cast %45 : vector<8x8xf32> to vector<1x8x8xf32>
    %54 = vector.shape_cast %46 : vector<8x8xf32> to vector<1x8x8xf32>
    %55 = vector.shape_cast %47 : vector<8x8xf32> to vector<1x8x8xf32>
    %56 = vector.shape_cast %48 : vector<8x8xf32> to vector<1x8x8xf32>
    %57 = vector.shape_cast %49 : vector<8x8xf32> to vector<1x8x8xf32>
    %58 = tpu.concatenate %50, %51, %52, %53, %54, %55, %56, %57 in 0 : vector<1x8x8xf32>, vector<1x8x8xf32>, vector<1x8x8xf32>, vector<1x8x8xf32>, vector<1x8x8xf32>, vector<1x8x8xf32>, vector<1x8x8xf32>, vector<1x8x8xf32> -> vector<8x8x8xf32>
    %59 = arith.truncf %58 : vector<8x8x8xf32> to vector<8x8x8xbf16>
    %60 = vector.extract_strided_slice %22 {offsets = [0, 0], sizes = [8, 8], strides = [1, 1]} : vector<16x32xf32> to vector<8x8xf32>
    %61 = vector.extract_strided_slice %22 {offsets = [0, 8], sizes = [8, 8], strides = [1, 1]} : vector<16x32xf32> to vector<8x8xf32>
    %62 = vector.extract_strided_slice %22 {offsets = [0, 16], sizes = [8, 8], strides = [1, 1]} : vector<16x32xf32> to vector<8x8xf32>
    %63 = vector.extract_strided_slice %22 {offsets = [0, 24], sizes = [8, 8], strides = [1, 1]} : vector<16x32xf32> to vector<8x8xf32>
    %64 = vector.extract_strided_slice %22 {offsets = [8, 0], sizes = [8, 8], strides = [1, 1]} : vector<16x32xf32> to vector<8x8xf32>
    %65 = vector.extract_strided_slice %22 {offsets = [8, 8], sizes = [8, 8], strides = [1, 1]} : vector<16x32xf32> to vector<8x8xf32>
    %66 = vector.extract_strided_slice %22 {offsets = [8, 16], sizes = [8, 8], strides = [1, 1]} : vector<16x32xf32> to vector<8x8xf32>
    %67 = vector.extract_strided_slice %22 {offsets = [8, 24], sizes = [8, 8], strides = [1, 1]} : vector<16x32xf32> to vector<8x8xf32>
    %68 = vector.shape_cast %60 : vector<8x8xf32> to vector<1x8x8xf32>
    %69 = vector.shape_cast %61 : vector<8x8xf32> to vector<1x8x8xf32>
    %70 = vector.shape_cast %62 : vector<8x8xf32> to vector<1x8x8xf32>
    %71 = vector.shape_cast %63 : vector<8x8xf32> to vector<1x8x8xf32>
    %72 = vector.shape_cast %64 : vector<8x8xf32> to vector<1x8x8xf32>
    %73 = vector.shape_cast %65 : vector<8x8xf32> to vector<1x8x8xf32>
    %74 = vector.shape_cast %66 : vector<8x8xf32> to vector<1x8x8xf32>
    %75 = vector.shape_cast %67 : vector<8x8xf32> to vector<1x8x8xf32>
    %76 = tpu.concatenate %68, %69, %70, %71, %72, %73, %74, %75 in 0 : vector<1x8x8xf32>, vector<1x8x8xf32>, vector<1x8x8xf32>, vector<1x8x8xf32>, vector<1x8x8xf32>, vector<1x8x8xf32>, vector<1x8x8xf32>, vector<1x8x8xf32> -> vector<8x8x8xf32>
    %77 = arith.truncf %76 : vector<8x8x8xf32> to vector<8x8x8xbf16>
    "tpu.trace_start"() <{level = 10 : i32, message = "zld,zdm->zlm"}> : () -> ()
    %cst_8 = arith.constant dense<0.000000e+00> : vector<8x8x8xf32>
    %78 = tpu.matmul %41, %59, %cst_8 {dimension_numbers = #tpu.dot_dimension_numbers<[2], [1], [1], [2], [0, 0, 0, 1, 1, 2], [0], [0]>} : vector<8x8x8xbf16>, vector<8x8x8xbf16>, vector<8x8x8xf32> -> vector<8x8x8xf32>
    "tpu.trace_stop"() : () -> ()
    %cst_9 = arith.constant 1.000000e+00 : f32
    %79 = vector.broadcast %cst_9 : f32 to vector<2x1x8xf32>
    %80 = arith.subf %79, %1 : vector<2x1x8xf32>
    %cst_10 = arith.constant -1.000000e+04 : f32
    %81 = vector.broadcast %cst_10 : f32 to vector<2x1x8xf32>
    %82 = arith.mulf %80, %81 : vector<2x1x8xf32>
    %83 = vector.extract_strided_slice %82 {offsets = [0, 0, 0], sizes = [1, 1, 8], strides = [1, 1, 1]} : vector<2x1x8xf32> to vector<1x1x8xf32>
    %84 = vector.extract_strided_slice %82 {offsets = [0, 0, 0], sizes = [1, 1, 8], strides = [1, 1, 1]} : vector<2x1x8xf32> to vector<1x1x8xf32>
    %85 = vector.extract_strided_slice %82 {offsets = [0, 0, 0], sizes = [1, 1, 8], strides = [1, 1, 1]} : vector<2x1x8xf32> to vector<1x1x8xf32>
    %86 = vector.extract_strided_slice %82 {offsets = [0, 0, 0], sizes = [1, 1, 8], strides = [1, 1, 1]} : vector<2x1x8xf32> to vector<1x1x8xf32>
    %87 = vector.extract_strided_slice %82 {offsets = [1, 0, 0], sizes = [1, 1, 8], strides = [1, 1, 1]} : vector<2x1x8xf32> to vector<1x1x8xf32>
    %88 = vector.extract_strided_slice %82 {offsets = [1, 0, 0], sizes = [1, 1, 8], strides = [1, 1, 1]} : vector<2x1x8xf32> to vector<1x1x8xf32>
    %89 = vector.extract_strided_slice %82 {offsets = [1, 0, 0], sizes = [1, 1, 8], strides = [1, 1, 1]} : vector<2x1x8xf32> to vector<1x1x8xf32>
    %90 = vector.extract_strided_slice %82 {offsets = [1, 0, 0], sizes = [1, 1, 8], strides = [1, 1, 1]} : vector<2x1x8xf32> to vector<1x1x8xf32>
    %91 = tpu.concatenate %83, %84, %85, %86, %87, %88, %89, %90 in 0 : vector<1x1x8xf32>, vector<1x1x8xf32>, vector<1x1x8xf32>, vector<1x1x8xf32>, vector<1x1x8xf32>, vector<1x1x8xf32>, vector<1x1x8xf32>, vector<1x1x8xf32> -> vector<8x1x8xf32>
    %92 = vector.broadcast %91 : vector<8x1x8xf32> to vector<8x8x8xf32>
    %93 = arith.addf %78, %92 : vector<8x8x8xf32>
    %cst_11 = arith.constant dense<0xFF800000> : vector<8x8xf32>
    %94 = vector.multi_reduction <maximumf>, %93, %cst_11 [2] : vector<8x8x8xf32> to vector<8x8xf32>
    %95 = vector.shape_cast %94 : vector<8x8xf32> to vector<8x8x1xf32>
    %96 = vector.broadcast %95 : vector<8x8x1xf32> to vector<8x8x8xf32>
    %97 = arith.subf %93, %96 : vector<8x8x8xf32>
    %98 = math.exp %97 : vector<8x8x8xf32>
    %cst_12 = arith.constant dense<0.000000e+00> : vector<8x8xf32>
    %99 = vector.multi_reduction <add>, %98, %cst_12 [2] : vector<8x8x8xf32> to vector<8x8xf32>
    %100 = vector.shape_cast %99 : vector<8x8xf32> to vector<8x8x1xf32>
    %101 = tpu.reciprocal %100 {approx = true} : vector<8x8x1xf32> -> vector<8x8x1xf32>
    %102 = vector.broadcast %101 : vector<8x8x1xf32> to vector<8x8x8xf32>
    %103 = arith.mulf %98, %102 : vector<8x8x8xf32>
    %104 = arith.truncf %103 : vector<8x8x8xf32> to vector<8x8x8xbf16>
    "tpu.trace_start"() <{level = 10 : i32, message = "zlm,zmd->zld"}> : () -> ()
    %cst_13 = arith.constant dense<0.000000e+00> : vector<8x8x8xf32>
    %105 = tpu.matmul %104, %77, %cst_13 {dimension_numbers = #tpu.dot_dimension_numbers<[2], [1], [1], [2], [0, 0, 0, 1, 1, 2], [0], [0]>} : vector<8x8x8xbf16>, vector<8x8x8xbf16>, vector<8x8x8xf32> -> vector<8x8x8xf32>
    "tpu.trace_stop"() : () -> ()
    %106 = vector.extract_strided_slice %105 {offsets = [0, 0, 0], sizes = [1, 8, 8], strides = [1, 1, 1]} : vector<8x8x8xf32> to vector<1x8x8xf32>
    %107 = vector.shape_cast %106 : vector<1x8x8xf32> to vector<8x8xf32>
    %108 = vector.extract_strided_slice %105 {offsets = [1, 0, 0], sizes = [1, 8, 8], strides = [1, 1, 1]} : vector<8x8x8xf32> to vector<1x8x8xf32>
    %109 = vector.shape_cast %108 : vector<1x8x8xf32> to vector<8x8xf32>
    %110 = vector.extract_strided_slice %105 {offsets = [2, 0, 0], sizes = [1, 8, 8], strides = [1, 1, 1]} : vector<8x8x8xf32> to vector<1x8x8xf32>
    %111 = vector.shape_cast %110 : vector<1x8x8xf32> to vector<8x8xf32>
    %112 = vector.extract_strided_slice %105 {offsets = [3, 0, 0], sizes = [1, 8, 8], strides = [1, 1, 1]} : vector<8x8x8xf32> to vector<1x8x8xf32>
    %113 = vector.shape_cast %112 : vector<1x8x8xf32> to vector<8x8xf32>
    %114 = tpu.concatenate %107, %109, %111, %113 in 1 : vector<8x8xf32>, vector<8x8xf32>, vector<8x8xf32>, vector<8x8xf32> -> vector<8x32xf32>
    %115 = vector.extract_strided_slice %105 {offsets = [4, 0, 0], sizes = [1, 8, 8], strides = [1, 1, 1]} : vector<8x8x8xf32> to vector<1x8x8xf32>
    %116 = vector.shape_cast %115 : vector<1x8x8xf32> to vector<8x8xf32>
    %117 = vector.extract_strided_slice %105 {offsets = [5, 0, 0], sizes = [1, 8, 8], strides = [1, 1, 1]} : vector<8x8x8xf32> to vector<1x8x8xf32>
    %118 = vector.shape_cast %117 : vector<1x8x8xf32> to vector<8x8xf32>
    %119 = vector.extract_strided_slice %105 {offsets = [6, 0, 0], sizes = [1, 8, 8], strides = [1, 1, 1]} : vector<8x8x8xf32> to vector<1x8x8xf32>
    %120 = vector.shape_cast %119 : vector<1x8x8xf32> to vector<8x8xf32>
    %121 = vector.extract_strided_slice %105 {offsets = [7, 0, 0], sizes = [1, 8, 8], strides = [1, 1, 1]} : vector<8x8x8xf32> to vector<1x8x8xf32>
    %122 = vector.shape_cast %121 : vector<1x8x8xf32> to vector<8x8xf32>
    %123 = tpu.concatenate %116, %118, %120, %122 in 1 : vector<8x8xf32>, vector<8x8xf32>, vector<8x8xf32>, vector<8x8xf32> -> vector<8x32xf32>
    %124 = tpu.concatenate %114, %123 in 0 : vector<8x32xf32>, vector<8x32xf32> -> vector<16x32xf32>
    %125 = arith.truncf %124 : vector<16x32xf32> to vector<16x32xbf16>
    %cst_14 = arith.constant dense<0.000000e+00> : vector<16x96xf32>
    %126 = tpu.matmul %125, %7, %cst_14 {dimension_numbers = #tpu.dot_dimension_numbers<[1], [0], [0], [1], [0, 0, 1, 1], [], []>} : vector<16x32xbf16>, vector<32x96xbf16>, vector<16x96xf32> -> vector<16x96xf32>
    %127 = vector.extract_strided_slice %126 {offsets = [0, 0], sizes = [16, 32], strides = [1, 1]} : vector<16x96xf32> to vector<16x32xf32>
    %128 = vector.broadcast %9 : vector<1x32xf32> to vector<16x32xf32>
    %129 = arith.addf %127, %128 : vector<16x32xf32>
    %130 = arith.addf %129, %0 : vector<16x32xf32>
    %cst_15 = arith.constant dense<0.000000e+00> : vector<16xf32>
    %131 = vector.multi_reduction <add>, %130, %cst_15 [1] : vector<16x32xf32> to vector<16xf32>
    %132 = vector.shape_cast %131 : vector<16xf32> to vector<16x1xf32>
    %cst_16 = arith.constant 3.200000e+01 : f32
    %133 = vector.broadcast %cst_16 : f32 to vector<16x1xf32>
    %134 = arith.divf %132, %133 : vector<16x1xf32>
    %135 = vector.broadcast %134 : vector<16x1xf32> to vector<16x32xf32>
    %136 = arith.subf %130, %135 : vector<16x32xf32>
    %137 = vector.broadcast %134 : vector<16x1xf32> to vector<16x32xf32>
    %138 = arith.subf %130, %137 : vector<16x32xf32>
    %139 = arith.mulf %136, %138 : vector<16x32xf32>
    %cst_17 = arith.constant dense<0.000000e+00> : vector<16xf32>
    %140 = vector.multi_reduction <add>, %139, %cst_17 [1] : vector<16x32xf32> to vector<16xf32>
    %141 = vector.shape_cast %140 : vector<16xf32> to vector<16x1xf32>
    %cst_18 = arith.constant 3.200000e+01 : f32
    %142 = vector.broadcast %cst_18 : f32 to vector<16x1xf32>
    %143 = arith.divf %141, %142 : vector<16x1xf32>
    %cst_19 = arith.constant 9.99999996E-13 : f32
    %144 = vector.broadcast %cst_19 : f32 to vector<16x1xf32>
    %145 = arith.addf %143, %144 : vector<16x1xf32>
    %146 = math.rsqrt %145 : vector<16x1xf32>
    %147 = vector.broadcast %134 : vector<16x1xf32> to vector<16x32xf32>
    %148 = arith.subf %130, %147 : vector<16x32xf32>
    %149 = vector.broadcast %146 : vector<16x1xf32> to vector<16x32xf32>
    %150 = arith.mulf %148, %149 : vector<16x32xf32>
    %151 = vector.broadcast %10 : vector<1x32xf32> to vector<16x32xf32>
    %152 = arith.mulf %150, %151 : vector<16x32xf32>
    %153 = vector.broadcast %11 : vector<1x32xf32> to vector<16x32xf32>
    %154 = arith.addf %152, %153 : vector<16x32xf32>
    %155 = arith.truncf %154 : vector<16x32xf32> to vector<16x32xbf16>
    %cst_20 = arith.constant dense<0.000000e+00> : vector<16x96xf32>
    %156 = tpu.matmul %155, %5, %cst_20 {dimension_numbers = #tpu.dot_dimension_numbers<[1], [0], [0], [1], [0, 0, 1, 1], [], []>} : vector<16x32xbf16>, vector<32x96xbf16>, vector<16x96xf32> -> vector<16x96xf32>
    %157 = vector.extract_strided_slice %156 {offsets = [0, 0], sizes = [16, 64], strides = [1, 1]} : vector<16x96xf32> to vector<16x64xf32>
    %158 = vector.broadcast %12 : vector<1x64xf32> to vector<16x64xf32>
    %159 = arith.addf %157, %158 : vector<16x64xf32>
    %cst_21 = arith.constant 5.000000e-01 : f32
    %160 = vector.broadcast %cst_21 : f32 to vector<16x64xf32>
    %161 = arith.mulf %160, %159 : vector<16x64xf32>
    %cst_22 = arith.constant 4.471500e-02 : f32
    %162 = vector.broadcast %cst_22 : f32 to vector<16x64xf32>
    %163 = arith.mulf %162, %159 : vector<16x64xf32>
    %164 = arith.mulf %163, %159 : vector<16x64xf32>
    %165 = arith.mulf %164, %159 : vector<16x64xf32>
    %166 = arith.addf %159, %165 : vector<16x64xf32>
    %cst_23 = arith.constant 0.797884583 : f32
    %167 = vector.broadcast %cst_23 : f32 to vector<16x64xf32>
    %168 = arith.mulf %167, %166 : vector<16x64xf32>
    %169 = math.tanh %168 : vector<16x64xf32>
    %cst_24 = arith.constant 1.000000e+00 : f32
    %170 = vector.broadcast %cst_24 : f32 to vector<16x64xf32>
    %171 = arith.addf %170, %169 : vector<16x64xf32>
    %172 = arith.mulf %161, %171 : vector<16x64xf32>
    %173 = arith.truncf %172 : vector<16x64xf32> to vector<16x64xbf16>
    %cst_25 = arith.constant dense<0.000000e+00> : vector<16x96xf32>
    %174 = tpu.matmul %173, %6, %cst_25 {dimension_numbers = #tpu.dot_dimension_numbers<[1], [0], [0], [1], [0, 0, 1, 1], [], []>} : vector<16x64xbf16>, vector<64x96xbf16>, vector<16x96xf32> -> vector<16x96xf32>
    %175 = vector.extract_strided_slice %174 {offsets = [0, 0], sizes = [16, 32], strides = [1, 1]} : vector<16x96xf32> to vector<16x32xf32>
    %176 = vector.broadcast %13 : vector<1x32xf32> to vector<16x32xf32>
    %177 = arith.addf %175, %176 : vector<16x32xf32>
    %178 = arith.addf %177, %154 : vector<16x32xf32>
    %cst_26 = arith.constant dense<0.000000e+00> : vector<16xf32>
    %179 = vector.multi_reduction <add>, %178, %cst_26 [1] : vector<16x32xf32> to vector<16xf32>
    %180 = vector.shape_cast %179 : vector<16xf32> to vector<16x1xf32>
    %cst_27 = arith.constant 3.200000e+01 : f32
    %181 = vector.broadcast %cst_27 : f32 to vector<16x1xf32>
    %182 = arith.divf %180, %181 : vector<16x1xf32>
    %183 = vector.broadcast %182 : vector<16x1xf32> to vector<16x32xf32>
    %184 = arith.subf %178, %183 : vector<16x32xf32>
    %185 = vector.broadcast %182 : vector<16x1xf32> to vector<16x32xf32>
    %186 = arith.subf %178, %185 : vector<16x32xf32>
    %187 = arith.mulf %184, %186 : vector<16x32xf32>
    %cst_28 = arith.constant dense<0.000000e+00> : vector<16xf32>
    %188 = vector.multi_reduction <add>, %187, %cst_28 [1] : vector<16x32xf32> to vector<16xf32>
    %189 = vector.shape_cast %188 : vector<16xf32> to vector<16x1xf32>
    %cst_29 = arith.constant 3.200000e+01 : f32
    %190 = vector.broadcast %cst_29 : f32 to vector<16x1xf32>
    %191 = arith.divf %189, %190 : vector<16x1xf32>
    %cst_30 = arith.constant 9.99999996E-13 : f32
    %192 = vector.broadcast %cst_30 : f32 to vector<16x1xf32>
    %193 = arith.addf %191, %192 : vector<16x1xf32>
    %194 = math.rsqrt %193 : vector<16x1xf32>
    %195 = vector.broadcast %182 : vector<16x1xf32> to vector<16x32xf32>
    %196 = arith.subf %178, %195 : vector<16x32xf32>
    %197 = vector.broadcast %194 : vector<16x1xf32> to vector<16x32xf32>
    %198 = arith.mulf %196, %197 : vector<16x32xf32>
    %199 = vector.broadcast %14 : vector<1x32xf32> to vector<16x32xf32>
    %200 = arith.mulf %198, %199 : vector<16x32xf32>
    %201 = vector.broadcast %15 : vector<1x32xf32> to vector<16x32xf32>
    %202 = arith.addf %200, %201 : vector<16x32xf32>
    %c0_31 = arith.constant 0 : index
    %c0_32 = arith.constant 0 : index
    %203 = vector.load %arg5[%c0_31, %c0_32] : memref<16x32xf32, #tpu.memory_space<vmem>>, vector<16x32xf32>
    tpu.vector_store %arg5[%c0_31, %c0_32], %202 {strides = array<i32>} : memref<16x32xf32, #tpu.memory_space<vmem>>, vector<16x32xf32>,
    return
  }
  func.func @transform_0(%arg0: i32) -> (i32, i32) {
    %c0_i32 = arith.constant 0 : i32
    %c0_i32_0 = arith.constant 0 : i32
    %c0_i32_1 = arith.constant 0 : i32
    return %c0_i32, %c0_i32_0 : i32, i32
  }
  func.func @transform_1(%arg0: i32) -> (i32, i32, i32) {
    %c0_i32 = arith.constant 0 : i32
    %c0_i32_0 = arith.constant 0 : i32
    %c0_i32_1 = arith.constant 0 : i32
    %c0_i32_2 = arith.constant 0 : i32
    return %c0_i32, %c0_i32_0, %c0_i32_1 : i32, i32, i32
  }
  func.func @transform_2(%arg0: i32) -> (i32, i32) {
    %c0_i32 = arith.constant 0 : i32
    %c0_i32_0 = arith.constant 0 : i32
    %c0_i32_1 = arith.constant 0 : i32
    return %c0_i32, %c0_i32_0 : i32, i32
  }
  func.func @transform_3(%arg0: i32) -> (i32, i32) {
    %c0_i32 = arith.constant 0 : i32
    %c0_i32_0 = arith.constant 0 : i32
    %c0_i32_1 = arith.constant 0 : i32
    return %c0_i32, %c0_i32_0 : i32, i32
  }
  func.func @transform_4(%arg0: i32) -> (i32, i32) {
    %c0_i32 = arith.constant 0 : i32
    %c0_i32_0 = arith.constant 0 : i32
    %c0_i32_1 = arith.constant 0 : i32
    return %c0_i32, %c0_i32_0 : i32, i32
  }
}

</mosaic_0001>

<bundles_post_ra>
// kernel: tpu_custom_call.1
= control target key start
LH: loop header
LB: loop body
LE: loop exit
PB: predicated region body
PF: predicated region fallthrough
CT: control target
= control target key end

     0   :  { %9 = vsyncpa [#allocation3], 0  ;;  %s2163_s0 = inlined_call_operand.hbm [shape: f32[16,32], index: 0, kind: input, shape index: {}]   ;;  %s2164_s1 = inlined_call_operand.vmem [shape: f32[2,1,8], index: 1, kind: input, shape index: {}]   ;;  %s2165_s2 = inlined_call_operand.hbm [shape: bf16[160,96], index: 2, kind: input, shape index: {}]   ;;  %s2166_s3 = inlined_call_operand.vmem [shape: f32[8,96], index: 3, kind: input, shape index: {}]   ;;  %s2167_s4 = inlined_call_operand.hbm [shape: f32[16,32], index: 4, kind: output, shape index: {}]  }
   0x1   :  { %10 = vsyncpa [#allocation6], 0 }
   0x2   :  { %11 = vsyncpa [#allocation4], 0  ;;  %s1826_s15 = smov [#allocation2]   ;;  %s1754_s19 = scalar_lea.hbm %s2163_s0, 256 }
   0x3   :  { %s17_s16 = sshll.u32 %s1826_s15, 4  ;;  %p1755_p0 = scmp.ne.s32.totalorder %s2163_s0, %s1754_s19  ;;  %s18_s16 = int_to_ptr.vmem [resolvable:$true] %s17_s16 }
   0x4   :  { %p1758_p1 = scmp.lt.u32.totalorder %s1754_s19, %s2163_s0 }
   0x6   :  { %p1760_p2 = pnand %p1758_p1, %p1755_p0 }
   0x8   :  { %1763 = shalt.err (!%p1760_p2)
}
   0x9   :  { %s1764_s24 = scalar_lea.vmem %s18_s16, 256  ;;  %p1769_p4 = scmp.lt.s32.totalorder %s18_s16, %s18_s16 }
   0xa   :  { %p1765_p3 = scmp.ne.s32.totalorder %s18_s16, %s1764_s24  ;;  %p1770_p5 = scmp.lt.s32.totalorder %s1764_s24, %s1764_s24 }
   0xc   :  { %p1771_p6 = por %p1770_p5, %p1769_p4 }
   0xe   :  { %p1772_p7 = pnand %p1771_p6, %p1765_p3 }
  0x10   :  { %1775 = shalt.err (!%p1772_p7)
}
  0x11   :  { %s1827_s25 = smov 128   ;;  %s1828_s26 = smov 8  }
  0x12   :  { %23 = dma.hbm_to_vmem [thread:$0]  %s2163_s0, 256, %s18_s16, [#allocation3], %s1827_s25, %s1827_s25, %s1828_s26  }
  0x13   :  { %s1829_s29 = smov [#allocation5]   ;;  %s1776_s7 = scalar_lea.hbm %s2165_s2, 1280 }
  0x14   :  { %s31_s30 = sshll.u32 %s1829_s29, 4  ;;  %p1777_p8 = scmp.ne.s32.totalorder %s2165_s2, %s1776_s7  ;;  %s32_s30 = int_to_ptr.vmem [resolvable:$true] %s31_s30 }
  0x15   :  { %p1780_p9 = scmp.lt.u32.totalorder %s1776_s7, %s2165_s2 }
  0x17   :  { %p1782_p10 = pnand %p1780_p9, %p1777_p8 }
  0x19   :  { %1785 = shalt.err (!%p1782_p10)
}
  0x1a   :  { %s1786_s12 = scalar_lea.vmem %s32_s30, 1280  ;;  %p1791_p12 = scmp.lt.s32.totalorder %s32_s30, %s32_s30 }
  0x1b   :  { %p1787_p11 = scmp.ne.s32.totalorder %s32_s30, %s1786_s12  ;;  %p1792_p13 = scmp.lt.s32.totalorder %s1786_s12, %s1786_s12 }
  0x1d   :  { %p1793_p0 = por %p1792_p13, %p1791_p12 }
  0x1f   :  { %p1794_p1 = pnand %p1793_p0, %p1787_p11 }
  0x21   :  { %1797 = shalt.err (!%p1794_p1)
}
  0x22   :  { %s1830_s0 = smov 64   ;;  %s1831_s13 = smov 4  }
  0x23   :  { %37 = dma.hbm_to_vmem [thread:$0]  %s2165_s2, 1280, %s32_s30, [#allocation6], %s1830_s0, %s1830_s0, %s1831_s13  }
  0x24   :  { %1820 = dma.done.wait [#allocation3], 256  }
  0x25   :  { %1821 = vsyncadd [#allocation3], 4294967040 }
  0x26   :  { %1822 = dma.done.wait [#allocation6], 1280  }
  0x27   :  { %1823 = vsyncadd [#allocation6], 4294966016  ;;  %v1832_v0 = vmov 0.0   ;;  %vm1833_vm0 = vmmov 0   ;;  %v1699_v1 = vld [vmem:[#allocation5] sm:$0xff]   ;;  %v1700_v2 = vld [vmem:[#allocation5 + $0x8] sm:$0xff]   ;;  %v73_v6 = vlaneseq }
  0x28   :  { %1527 = vmatprep.subr.bf16.mxu0 %v1832_v0  ;;  %1531 = vmatprep.mubr.msk.bf16.mxu0 %vm1833_vm0, %v1832_v0  ;;  %v1901_v3 = vld [vmem:[#allocation2] sm:$0xff]  ;;  %v1903_v4 = vld [vmem:[#allocation2 + $0x8] sm:$0xff]  ;;  %vm89_vm1 = vcmask 261120   ;;  %s1834_s17 = smov 96   ;;  %s1835_s18 = smov 120   ;;  %vm244_vm2 = vcmask 1043456  }
  0x29   :  { %1535 = vmatprep.subr.bf16.mxu1 %v1832_v0  ;;  %1537 = vmatprep.mubr.msk.bf16.mxu1 %vm1833_vm0, %v1832_v0  ;;  %v72_v5 = vpack.c.bf16 %v1903_v4, %v1901_v3  ;;  %v1912_v7 = vshrl.u32 %v73_v6, 7  ;;  %v1920_v9 = vld [vmem:[%s2166_s3] sm:$0xff]  ;;  %s1836_s19 = smov 104   ;;  %s1837_s20 = smov 112   ;;  %vm240_vm3 = vcmask 64512   ;;  %vm1111_vm4 = vcmask 130048  }
  0x2a   :  { %1528 = vmatpush3.bf16.msra.mxu0 %v1699_v1  ;;  %v49_v63 = vld [vmem:[%s2164_s1] sm:$0x1]  ;;  %s1839_s27 = smov 24   ;;  %vm1113_vm5 = vcmask 195584   ;;  %vm1340_vm6 = vcmask 523264   ;;  %s1840_s30 = smov [#allocation7]  }
  0x2b   :  { %1529 = vmatprep.subr.bf16.mxu0 %v1832_v0  ;;  %v1915_v8 = vsub.s32 0, %v1912_v7  ;;  %v224_v1 = vsub.f32 1.0, %v49_v63  ;;  %s1438_s5 = sshll.u32 %s1840_s30, 4  ;;  %s1439_s5 = int_to_ptr.vmem [resolvable:$true] %s1438_s5 }
  0x2c   :  { %s1798_s6 = scalar_lea.vmem %s1439_s5, 256  ;;  %p1803_p3 = scmp.lt.s32.totalorder %s1439_s5, %s1439_s5 }
  0x2d   :  { %v76_v10 = vrot.slane %v1920_v9, %v1915_v8  ;;  %p1799_p2 = scmp.ne.s32.totalorder %s1439_s5, %s1798_s6  ;;  %p1804_p4 = scmp.lt.s32.totalorder %s1798_s6, %s1798_s6 }
  0x2e   :  { %1530 = vmatpush3.bf16.msra.mxu0 %v1700_v2  ;;  %v226_v2 = vmul.f32 -10000.0, %v224_v1 }
  0x2f   :  { %1559 = vmatprep.subr.bf16.mxu0 %v1832_v0  ;;  %p1805_p5 = por %p1804_p4, %p1803_p3 }
  0x31   :  { %1532 = vmatmul.mubr.msk.bf16.vlgmr.msra.gmra.mrb[0].mxu0 %vm89_vm1, %v72_v5  ;;  %v233_v5 = vrot.slane %v226_v2, %v1915_v8  ;;  %p1806_p6 = pnand %p1805_p5, %p1799_p2 }
  0x32   :  { %1561 = vmatprep.mubr.msk.bf16.mxu0 %vm1833_vm0, %v1832_v0 }
 0x104   :  { %v127_v11 = vpop.f32.mrb[0].mxu0 }
 0x105   :  { %v128_v12 = vadd.f32 %v127_v11, %v76_v10  ;;  %v1533_v13 = vpop.f32.mrb[1].mxu0 }
 0x106   :  { %v130_v14 = vpop.f32.mrb[2].mxu0 }
 0x107   :  { %136 = vrot.lane.b32.xlu0 %v128_v12, %s1834_s17  ;;  %v1534_v15 = vpop.f32.mrb[3].mxu0  ;;  %v1924_v16 = vadd.f32 %v130_v14, %v76_v10  ;;  %v192_v19 = vpack.c.bf16 %v128_v12, %v128_v12 }
 0x109   :  { %v1974_v49 = vpack.c.bf16 %v1924_v16, %v1924_v16 }
 0x10b   :  { %138 = vrot.lane.b32.xlu0 %v1924_v16, %s1834_s17 }
 0x10f   :  { %174 = vrot.lane.b32.xlu0 %v128_v12, %s1835_s18 }
 0x113   :  { %180 = vrot.lane.b32.xlu0 %v128_v12, %s1836_s19 }
 0x179   :  { %v137_v17 = vpop.permute.xlu0 %136 }
 0x17a   :  { %142 = vxpose.xlu1.b32.start [1/2] (short) (narrow) %v137_v17, 32 }
 0x17d   :  { %v139_v18 = vpop.permute.xlu0 %138 }
 0x17e   :  { %143 = vxpose.xlu1.b32.end [2/2] (short) (narrow) %v139_v18, 32 }
 0x181   :  { %v175_v29 = vpop.permute.xlu0 %174 }
 0x182   :  { %v1941_v31 = vpack.c.bf16 %v175_v29, %v175_v29 }
 0x185   :  { %v181_v38 = vpop.permute.xlu0 %180 }
 0x186   :  { %v1962_v39 = vpack.c.bf16 %v181_v38, %v181_v38 }
 0x1a4   :  { %177 = vrot.lane.b32.xlu1 %v128_v12, %s1837_s20 }
 0x1a8   :  { %707 = vrot.lane.b32.xlu1 %v192_v19, %s1830_s0 }
 0x1fa   :  { %v158_v20 = vpop.trf.xlu1 }
 0x1fb   :  { %v216_v21 = vpack.c.bf16 %v158_v20, %v158_v20 }
 0x1fd   :  { %v246_v22 = vsel %vm244_vm2, %v216_v21, 0 }
 0x1fe   :  { %1536 = vmatpush3.bf16.msra.mxu1 %v246_v22  ;;  %v159_v23 = vpop.trf.xlu1 }
 0x1ff   :  { %v217_v24 = vpack.c.bf16 %v159_v23, %v159_v23  ;;  %v1674_v25 = vpack.i.bf16 %v159_v23, %v158_v20  ;;  %1541 = vmatprep.subr.bf16.mxu1 %v1832_v0 }
 0x201   :  { %1538 = vmatmul.mubr.msk.bf16.vlgmr.msra.gmra.mrb[0].mxu1 %vm240_vm3, %v192_v19  ;;  %1675 = vrot.lane.b32.xlu0 %v1674_v25, %s1835_s18  ;;  %v292_v26 = vsel %vm244_vm2, %v217_v24, 0 }
 0x202   :  { %1542 = vmatpush3.bf16.msra.mxu1 %v292_v26  ;;  %v160_v27 = vpop.trf.xlu1  ;;  %1543 = vmatprep.mubr.msk.bf16.mxu1 %vm1833_vm0, %v1832_v0 }
 0x203   :  { %v218_v28 = vpack.c.bf16 %v160_v27, %v160_v27  ;;  %1547 = vmatprep.subr.bf16.mxu1 %v1832_v0 }
 0x205   :  { %183 = vrot.lane.b32.xlu0 %v1924_v16, %s1835_s18  ;;  %v338_v33 = vsel %vm244_vm2, %v218_v28, 0 }
 0x206   :  { %v161_v30 = vpop.trf.xlu1 }
 0x207   :  { %v1679_v32 = vpack.i.bf16 %v161_v30, %v160_v27  ;;  %v219_v34 = vpack.c.bf16 %v161_v30, %v161_v30 }
 0x209   :  { %1680 = vrot.lane.b32.xlu0 %v1679_v32, %s1835_s18  ;;  %1544 = vmatmul.mubr.msk.bf16.vlgmr.msra.gmra.mrb[4].mxu1 %vm240_vm3, %v1941_v31  ;;  %v384_v37 = vsel %vm244_vm2, %v219_v34, 0  ;;  %v50_v34 = vld [vmem:[%s2164_s1 + $0x1] sm:$0x1]  ;;  %s1838_s1 = smov 16  }
 0x20a   :  { %1548 = vmatpush3.bf16.msra.mxu1 %v338_v33  ;;  %1549 = vmatprep.mubr.msk.bf16.mxu1 %vm1833_vm0, %v1832_v0 }
 0x20b   :  { %1553 = vmatprep.subr.bf16.mxu1 %v1832_v0 }
 0x20d   :  { %186 = vrot.lane.b32.xlu0 %v1924_v16, %s1837_s20 }
 0x211   :  { %189 = vrot.lane.b32.xlu0 %v1924_v16, %s1836_s19 }
 0x216   :  { %v178_v35 = vpop.permute.xlu1 %177 }
 0x217   :  { %v1954_v36 = vpack.c.bf16 %v178_v35, %v178_v35  ;;  %v225_v35 = vsub.f32 1.0, %v50_v34 }
 0x219   :  { %1550 = vmatmul.mubr.msk.bf16.vlgmr.msra.gmra.mrb[8].mxu1 %vm240_vm3, %v1954_v36 }
 0x21a   :  { %1554 = vmatpush3.bf16.msra.mxu1 %v384_v37  ;;  %1555 = vmatprep.mubr.msk.bf16.mxu1 %vm1833_vm0, %v1832_v0  ;;  %v708_v58 = vpop.permute.xlu1 %707  ;;  %v227_v37 = vmul.f32 -10000.0, %v225_v35 }
 0x21b   :  { %1565 = vmatprep.subr.bf16.mxu1 %v1832_v0  ;;  %v713_v61 = vsel %vm244_vm2, %v708_v58, 0 }
 0x21c   :  { %v237_v38 = vrot.slane %v227_v37, %v1915_v8 }
 0x221   :  { %1556 = vmatmul.mubr.msk.bf16.vlgmr.msra.gmra.mrb[12].mxu1 %vm240_vm3, %v1962_v39 }
 0x222   :  { %1567 = vmatprep.mubr.msk.bf16.mxu1 %vm1833_vm0, %v1832_v0 }
 0x273   :  { %v1676_v40 = vpop.permute.xlu0 %1675 }
 0x274   :  { %v1678_v41 = vunpack.i.h.bf16 %v1676_v40  ;;  %v1677_v42 = vunpack.i.l.bf16 %v1676_v40 }
 0x276   :  { %v221_v43 = vpack.c.bf16 %v1678_v41, %v1678_v41  ;;  %v220_v44 = vpack.c.bf16 %v1677_v42, %v1677_v42 }
 0x277   :  { %v184_v45 = vpop.permute.xlu0 %183 }
 0x278   :  { %v430_v46 = vsel %vm244_vm2, %v220_v44, 0  ;;  %v476_v47 = vsel %vm244_vm2, %v221_v43, 0  ;;  %v1970_v48 = vpack.c.bf16 %v184_v45, %v184_v45 }
 0x279   :  { %1560 = vmatpush3.bf16.msra.mxu0 %v430_v46  ;;  %1566 = vmatpush3.bf16.msra.mxu1 %v476_v47 }
 0x27a   :  { %1571 = vmatprep.subr.bf16.mxu0 %v1832_v0  ;;  %1577 = vmatprep.subr.bf16.mxu1 %v1832_v0 }
 0x27b   :  { %v1681_v50 = vpop.permute.xlu0 %1680 }
 0x27c   :  { %v1683_v51 = vunpack.i.h.bf16 %v1681_v50  ;;  %v1682_v52 = vunpack.i.l.bf16 %v1681_v50  ;;  %1562 = vmatmul.mubr.msk.bf16.vlgmr.msra.gmra.mrb[4].mxu0 %vm240_vm3, %v1974_v49  ;;  %1568 = vmatmul.mubr.msk.bf16.vlgmr.msra.gmra.mrb[16].mxu1 %vm240_vm3, %v1970_v48 }
 0x27d   :  { %1573 = vmatprep.mubr.msk.bf16.mxu0 %vm1833_vm0, %v1832_v0  ;;  %1579 = vmatprep.mubr.msk.bf16.mxu1 %vm1833_vm0, %v1832_v0 }
 0x27e   :  { %v223_v53 = vpack.c.bf16 %v1683_v51, %v1683_v51  ;;  %v222_v54 = vpack.c.bf16 %v1682_v52, %v1682_v52 }
 0x27f   :  { %v187_v55 = vpop.permute.xlu0 %186 }
 0x280   :  { %v522_v56 = vsel %vm244_vm2, %v222_v54, 0  ;;  %v568_v57 = vsel %vm244_vm2, %v223_v53, 0  ;;  %v1988_v59 = vpack.c.bf16 %v187_v55, %v187_v55 }
 0x281   :  { %1572 = vmatpush3.bf16.msra.mxu0 %v522_v56  ;;  %1578 = vmatpush3.bf16.msra.mxu1 %v568_v57 }
 0x282   :  { %1583 = vmatprep.subr.bf16.mxu0 %v1832_v0  ;;  %1589 = vmatprep.subr.bf16.mxu1 %v1832_v0 }
 0x283   :  { %v190_v60 = vpop.permute.xlu0 %189 }
 0x284   :  { %v1993_v62 = vpack.c.bf16 %v190_v60, %v190_v60  ;;  %1574 = vmatmul.mubr.msk.bf16.vlgmr.msra.gmra.mrb[8].mxu0 %vm240_vm3, %v1988_v59 }
 0x285   :  { %1584 = vmatpush3.bf16.msra.mxu0 %v713_v61  ;;  %1585 = vmatprep.mubr.msk.bf16.mxu0 %vm1833_vm0, %v1832_v0 }
 0x286   :  { %1580 = vmatmul.mubr.msk.bf16.vlgmr.msra.gmra.mrb[20].mxu1 %vm240_vm3, %v1993_v62  ;;  %1595 = vmatprep.subr.bf16.mxu0 %v1832_v0 }
 0x287   :  { %1591 = vmatprep.mubr.msk.bf16.mxu1 %vm1833_vm0, %v1832_v0 }
 0x2d4   :  { %v282_v6 = vpop.f32.mrb[0].mxu1 }
 0x2d5   :  { %v2008_v10 = vadd.f32 %v282_v6, %v233_v5  ;;  %v1539_v11 = vpop.f32.mrb[1].mxu1 }
 0x2d6   :  { %v285_v12 = vpop.f32.mrb[2].mxu1 }
 0x2d7   :  { %v1540_v13 = vpop.f32.mrb[3].mxu1  ;;  %v610_v14 = vsel %vm240_vm3, %v2008_v10, -inf }
 0x2d8   :  { %611 = vmax.xlane.f32.xlu0 %v610_v14 }
 0x2dc   :  { %v328_v15 = vpop.f32.mrb[4].mxu1 }
 0x2dd   :  { %v329_v16 = vadd.f32 %v328_v15, %v233_v5  ;;  %v1545_v17 = vpop.f32.mrb[5].mxu1 }
 0x2de   :  { %v331_v18 = vpop.f32.mrb[6].mxu1 }
 0x2df   :  { %v1546_v19 = vpop.f32.mrb[7].mxu1  ;;  %v613_v20 = vsel %vm240_vm3, %v329_v16, -inf }
 0x2e0   :  { %614 = vmax.xlane.f32.xlu1 %v613_v20 }
 0x2ec   :  { %v374_v21 = vpop.f32.mrb[8].mxu1 }
 0x2ed   :  { %v375_v22 = vadd.f32 %v374_v21, %v233_v5  ;;  %v1551_v23 = vpop.f32.mrb[9].mxu1 }
 0x2ee   :  { %v377_v24 = vpop.f32.mrb[10].mxu1 }
 0x2ef   :  { %v1552_v25 = vpop.f32.mrb[11].mxu1  ;;  %v616_v26 = vsel %vm240_vm3, %v375_v22, -inf }
 0x2f0   :  { %617 = vmax.xlane.f32.xlu0 %v616_v26 }
 0x2f4   :  { %v420_v27 = vpop.f32.mrb[12].mxu1 }
 0x2f5   :  { %v421_v28 = vadd.f32 %v420_v27, %v233_v5  ;;  %v1557_v29 = vpop.f32.mrb[13].mxu1 }
 0x2f6   :  { %v423_v30 = vpop.f32.mrb[14].mxu1 }
 0x2f7   :  { %v1558_v32 = vpop.f32.mrb[15].mxu1  ;;  %v619_v33 = vsel %vm240_vm3, %v421_v28, -inf }
 0x2f8   :  { %620 = vmax.xlane.f32.xlu0 %v619_v33 }
 0x34f   :  { %v466_v40 = vpop.f32.mrb[4].mxu0  ;;  %v512_v41 = vpop.f32.mrb[16].mxu1 }
 0x350   :  { %v467_v42 = vadd.f32 %v466_v40, %v237_v38  ;;  %v1563_v43 = vpop.f32.mrb[5].mxu0  ;;  %v1569_v44 = vpop.f32.mrb[17].mxu1  ;;  %v513_v47 = vadd.f32 %v512_v41, %v237_v38 }
 0x351   :  { %v469_v45 = vpop.f32.mrb[6].mxu0  ;;  %v515_v46 = vpop.f32.mrb[18].mxu1 }
 0x352   :  { %v1564_v50 = vpop.f32.mrb[7].mxu0  ;;  %v1570_v51 = vpop.f32.mrb[19].mxu1  ;;  %v622_v52 = vsel %vm240_vm3, %v467_v42, -inf  ;;  %v625_v53 = vsel %vm240_vm3, %v513_v47, -inf }
 0x353   :  { %623 = vmax.xlane.f32.xlu0 %v622_v52 }
 0x357   :  { %626 = vmax.xlane.f32.xlu0 %v625_v53  ;;  %v558_v54 = vpop.f32.mrb[8].mxu0 }
 0x358   :  { %v559_v55 = vadd.f32 %v558_v54, %v237_v38  ;;  %v1575_v56 = vpop.f32.mrb[9].mxu0 }
 0x359   :  { %v561_v8 = vpop.f32.mrb[10].mxu0  ;;  %v604_v57 = vpop.f32.mrb[20].mxu1 }
 0x35a   :  { %v605_v58 = vadd.f32 %v604_v57, %v237_v38  ;;  %v1576_v60 = vpop.f32.mrb[11].mxu0  ;;  %v1581_v61 = vpop.f32.mrb[21].mxu1  ;;  %v628_v63 = vsel %vm240_vm3, %v559_v55, -inf }
 0x35b   :  { %v607_v1 = vpop.f32.mrb[22].mxu1  ;;  %629 = vmax.xlane.f32.xlu1 %v628_v63 }
 0x35c   :  { %v1582_v2 = vpop.f32.mrb[23].mxu1  ;;  %v631_v5 = vsel %vm240_vm3, %v605_v58, -inf }
 0x35d   :  { %632 = vmax.xlane.f32.xlu0 %v631_v5 }
 0x365   :  { %v612_v11 = vpop.xlane.xlu0 %611 }
 0x366   :  { %v634_v13 = vsub.f32 %v2008_v10, %v612_v11 }
 0x368   :  { %v642_v18 = vmul.f32 1.442695, %v634_v13 }
 0x36c   :  { %805 = vrot.lane.b32.xlu1 %v1954_v36, %s1830_s0 }
 0x36d   :  { %v615_v6 = vpop.xlane.xlu1 %614 }
 0x36e   :  { %v635_v12 = vsub.f32 %v329_v16, %v615_v6 }
 0x370   :  { %854 = vrot.lane.b32.xlu1 %v1962_v39, %s1830_s0  ;;  %v644_v15 = vmul.f32 1.442695, %v635_v12 }
 0x372   :  { %1709 = vpow2.f32 %v644_v15 }
 0x373   :  { %756 = vrot.lane.b32.xlu0 %v1941_v31, %s1830_s0  ;;  %1711 = vpow2.f32 %v642_v18 }
 0x37c   :  { %v1710_v39 = vpop.eup %1709 }
 0x37d   :  { %v618_v14 = vpop.xlane.xlu0 %617  ;;  %v1712_v23 = vpop.eup %1711  ;;  %v661_v31 = vsel %vm240_vm3, %v1710_v39, 0.0 }
 0x37e   :  { %v636_v17 = vsub.f32 %v375_v22, %v618_v14  ;;  %v658_v10 = vsel %vm240_vm3, %v1712_v23, 0.0 }
 0x380   :  { %v646_v19 = vmul.f32 1.442695, %v636_v17 }
 0x382   :  { %1713 = vpow2.f32 %v646_v19 }
 0x385   :  { %v621_v20 = vpop.xlane.xlu0 %620 }
 0x386   :  { %v637_v36 = vsub.f32 %v421_v28, %v621_v20 }
 0x388   :  { %v648_v21 = vmul.f32 1.442695, %v637_v36 }
 0x38a   :  { %1715 = vpow2.f32 %v648_v21 }
 0x38c   :  { %v2031_v16 = vpop.eup %1713 }
 0x38d   :  { %v664_v25 = vsel %vm240_vm3, %v2031_v16, 0.0 }
 0x392   :  { %662 = vadd.xlane.f32.xlu0 %v661_v31 }
 0x394   :  { %v2034_v24 = vpop.eup %1715  ;;  %659 = vadd.xlane.f32.xlu1 %v658_v10 }
 0x395   :  { %v667_v22 = vsel %vm240_vm3, %v2034_v24, 0.0 }
 0x396   :  { %668 = vadd.xlane.f32.xlu0 %v667_v22 }
 0x398   :  { %665 = vadd.xlane.f32.xlu1 %v664_v25 }
 0x3a9   :  { %952 = vrot.lane.b32.xlu1 %v1970_v48, %s1830_s0 }
 0x3ac   :  { %903 = vrot.lane.b32.xlu0 %v1974_v49, %s1830_s0 }
 0x3e0   :  { %v624_v26 = vpop.xlane.xlu0 %623 }
 0x3e1   :  { %v638_v27 = vsub.f32 %v467_v42, %v624_v26 }
 0x3e3   :  { %v650_v28 = vmul.f32 1.442695, %v638_v27 }
 0x3e4   :  { %v627_v29 = vpop.xlane.xlu0 %626 }
 0x3e5   :  { %1717 = vpow2.f32 %v650_v28  ;;  %v639_v30 = vsub.f32 %v513_v47, %v627_v29 }
 0x3e7   :  { %v652_v32 = vmul.f32 1.442695, %v639_v30 }
 0x3e8   :  { %v630_v33 = vpop.xlane.xlu1 %629 }
 0x3e9   :  { %1719 = vpow2.f32 %v652_v32  ;;  %v640_v34 = vsub.f32 %v559_v55, %v630_v33 }
 0x3ea   :  { %v633_v35 = vpop.xlane.xlu0 %632 }
 0x3eb   :  { %v654_v37 = vmul.f32 1.442695, %v640_v34  ;;  %v641_v38 = vsub.f32 %v605_v58, %v633_v35 }
 0x3ec   :  { %v806_v51 = vpop.permute.xlu1 %805 }
 0x3ed   :  { %1721 = vpow2.f32 %v654_v37  ;;  %v656_v40 = vmul.f32 1.442695, %v641_v38  ;;  %v811_v2 = vsel %vm244_vm2, %v806_v51, 0 }
 0x3ee   :  { %v757_v41 = vpop.permute.xlu0 %756 }
 0x3ef   :  { %v2044_v48 = vpop.eup %1717  ;;  %1723 = vpow2.f32 %v656_v40  ;;  %v762_v49 = vsel %vm244_vm2, %v757_v41, 0 }
 0x3f0   :  { %1590 = vmatpush3.bf16.msra.mxu1 %v762_v49  ;;  %v670_v42 = vsel %vm240_vm3, %v2044_v48, 0.0  ;;  %v855_v52 = vpop.permute.xlu1 %854 }
 0x3f1   :  { %671 = vadd.xlane.f32.xlu1 %v670_v42  ;;  %1601 = vmatprep.subr.bf16.mxu1 %v1832_v0 }
 0x3f3   :  { %v2050_v43 = vpop.eup %1719 }
 0x3f4   :  { %v673_v44 = vsel %vm240_vm3, %v2050_v43, 0.0 }
 0x3f5   :  { %674 = vadd.xlane.f32.xlu0 %v673_v44 }
 0x3f7   :  { %v2054_v45 = vpop.eup %1721 }
 0x3f8   :  { %v676_v46 = vsel %vm240_vm3, %v2054_v45, 0.0 }
 0x3f9   :  { %v2058_v47 = vpop.eup %1723  ;;  %677 = vadd.xlane.f32.xlu1 %v676_v46 }
 0x3fa   :  { %v679_v50 = vsel %vm240_vm3, %v2058_v47, 0.0 }
 0x3fb   :  { %680 = vadd.xlane.f32.xlu0 %v679_v50 }
 0x40a   :  { %1050 = vrot.lane.b32.xlu1 %v1993_v62, %s1830_s0  ;;  %v860_v62 = vsel %vm244_vm2, %v855_v52, 0  ;;  %v1701_v52 = vld [vmem:[#allocation5 + $0x40] sm:$0xff]  }
 0x411   :  { %1001 = vrot.lane.b32.xlu0 %v1988_v59, %s1830_s0 }
 0x41f   :  { %v663_v53 = vpop.xlane.xlu0 %662 }
 0x420   :  { %1725 = vrcp.f32 %v663_v53 }
 0x421   :  { %v660_v54 = vpop.xlane.xlu1 %659 }
 0x422   :  { %1727 = vrcp.f32 %v660_v54 }
 0x423   :  { %v669_v55 = vpop.xlane.xlu0 %668 }
 0x424   :  { %1729 = vrcp.f32 %v669_v55 }
 0x425   :  { %v666_v56 = vpop.xlane.xlu1 %665 }
 0x426   :  { %1731 = vrcp.f32 %v666_v56 }
 0x427   :  { %v904_v13 = vpop.permute.xlu0 %903 }
 0x428   :  { %v909_v17 = vsel %vm244_vm2, %v904_v13, 0 }
 0x429   :  { %v953_v11 = vpop.permute.xlu1 %952 }
 0x42a   :  { %v1726_v8 = vpop.eup %1725  ;;  %v958_v14 = vsel %vm244_vm2, %v953_v11, 0 }
 0x42b   :  { %v691_v57 = vmul.f32 %v1726_v8, %v1710_v39  ;;  %v1702_v8 = vld [vmem:[#allocation5 + $0x48] sm:$0xff]  }
 0x42c   :  { %v1728_v58 = vpop.eup %1727 }
 0x42d   :  { %v690_v60 = vmul.f32 %v1728_v58, %v1712_v23  ;;  %v699_v61 = vpack.c.bf16 %v691_v57, %v691_v57 }
 0x42e   :  { %v1730_v63 = vpop.eup %1729 }
 0x42f   :  { %1592 = vmatmul.mubr.msk.bf16.vlgmr.msra.gmra.mrb[24].mxu1 %vm240_vm3, %v699_v61  ;;  %v698_v59 = vpack.c.bf16 %v690_v60, %v690_v60  ;;  %v693_v5 = vmul.f32 %v1730_v63, %v2034_v24 }
 0x430   :  { %v1732_v1 = vpop.eup %1731  ;;  %1602 = vmatpush3.bf16.msra.mxu1 %v860_v62  ;;  %1603 = vmatprep.mubr.msk.bf16.mxu1 %vm1833_vm0, %v1832_v0 }
 0x431   :  { %1586 = vmatmul.mubr.msk.bf16.vlgmr.msra.gmra.mrb[12].mxu0 %vm240_vm3, %v698_v59  ;;  %1613 = vmatprep.subr.bf16.mxu1 %v1832_v0  ;;  %v692_v6 = vmul.f32 %v1732_v1, %v2031_v16  ;;  %v701_v12 = vpack.c.bf16 %v693_v5, %v693_v5 }
 0x432   :  { %1596 = vmatpush3.bf16.msra.mxu0 %v811_v2  ;;  %1597 = vmatprep.mubr.msk.bf16.mxu0 %vm1833_vm0, %v1832_v0 }
 0x433   :  { %1607 = vmatprep.subr.bf16.mxu0 %v1832_v0  ;;  %v700_v15 = vpack.c.bf16 %v692_v6, %v692_v6 }
 0x437   :  { %1604 = vmatmul.mubr.msk.bf16.vlgmr.msra.gmra.mrb[28].mxu1 %vm240_vm3, %v701_v12 }
 0x438   :  { %1614 = vmatpush3.bf16.msra.mxu1 %v958_v14  ;;  %1615 = vmatprep.mubr.msk.bf16.mxu1 %vm1833_vm0, %v1832_v0 }
 0x439   :  { %1598 = vmatmul.mubr.msk.bf16.vlgmr.msra.gmra.mrb[16].mxu0 %vm240_vm3, %v700_v15  ;;  %1625 = vmatprep.subr.bf16.mxu1 %v1832_v0 }
 0x43a   :  { %1608 = vmatpush3.bf16.msra.mxu0 %v909_v17  ;;  %1609 = vmatprep.mubr.msk.bf16.mxu0 %vm1833_vm0, %v1832_v0 }
 0x43b   :  { %1619 = vmatprep.subr.bf16.mxu0 %v1832_v0 }
 0x47e   :  { %v672_v18 = vpop.xlane.xlu1 %671 }
 0x47f   :  { %1733 = vrcp.f32 %v672_v18 }
 0x482   :  { %v675_v19 = vpop.xlane.xlu0 %674 }
 0x483   :  { %1735 = vrcp.f32 %v675_v19 }
 0x486   :  { %v678_v20 = vpop.xlane.xlu1 %677 }
 0x487   :  { %1737 = vrcp.f32 %v678_v20 }
 0x488   :  { %v681_v36 = vpop.xlane.xlu0 %680 }
 0x489   :  { %v1734_v21 = vpop.eup %1733  ;;  %1739 = vrcp.f32 %v681_v36 }
 0x48a   :  { %v694_v39 = vmul.f32 %v1734_v21, %v2044_v48  ;;  %v1051_v22 = vpop.permute.xlu1 %1050 }
 0x48b   :  { %v1056_v28 = vsel %vm244_vm2, %v1051_v22, 0 }
 0x48c   :  { %v1002_v23 = vpop.permute.xlu0 %1001  ;;  %v702_v31 = vpack.c.bf16 %v694_v39, %v694_v39 }
 0x48d   :  { %v1736_v16 = vpop.eup %1735  ;;  %v1007_v10 = vsel %vm244_vm2, %v1002_v23, 0 }
 0x48e   :  { %v695_v24 = vmul.f32 %v1736_v16, %v2050_v43  ;;  %1610 = vmatmul.mubr.msk.bf16.vlgmr.msra.gmra.mrb[20].mxu0 %vm240_vm3, %v702_v31 }
 0x48f   :  { %1620 = vmatpush3.bf16.msra.mxu0 %v1007_v10  ;;  %1621 = vmatprep.mubr.msk.bf16.mxu0 %vm1833_vm0, %v1832_v0 }
 0x490   :  { %v703_v25 = vpack.c.bf16 %v695_v24, %v695_v24  ;;  %1631 = vmatprep.subr.bf16.mxu0 %v1832_v0 }
 0x491   :  { %v1738_v26 = vpop.eup %1737 }
 0x492   :  { %v696_v27 = vmul.f32 %v1738_v26, %v2054_v45  ;;  %1616 = vmatmul.mubr.msk.bf16.vlgmr.msra.gmra.mrb[32].mxu1 %vm240_vm3, %v703_v25 }
 0x493   :  { %v1740_v29 = vpop.eup %1739  ;;  %1626 = vmatpush3.bf16.msra.mxu1 %v1056_v28  ;;  %1627 = vmatprep.mubr.msk.bf16.mxu1 %vm1833_vm0, %v1832_v0 }
 0x494   :  { %v697_v30 = vmul.f32 %v1740_v29, %v2058_v47  ;;  %v704_v32 = vpack.c.bf16 %v696_v27, %v696_v27  ;;  %1639 = vmatprep.subr.bf16.mxu1 %v1832_v0  ;;  %v1189_v27 = vsub.s32 1, %v1912_v7 }
 0x496   :  { %1622 = vmatmul.mubr.msk.bf16.vlgmr.msra.gmra.mrb[24].mxu0 %vm240_vm3, %v704_v32  ;;  %v705_v33 = vpack.c.bf16 %v697_v30, %v697_v30  ;;  %v1190_v28 = vrot.slane %v1920_v9, %v1189_v27 }
 0x497   :  { %1635 = vmatprep.mubr.msk.bf16.mxu0 %vm1833_vm0, %v1832_v0  ;;  %1632 = vmatpush3.bf16.msra.mxu0 %v1701_v52 }
 0x498   :  { %1633 = vmatprep.subr.bf16.mxu0 %v1832_v0 }
 0x49a   :  { %1628 = vmatmul.mubr.msk.bf16.vlgmr.msra.gmra.mrb[36].mxu1 %vm240_vm3, %v705_v33 }
 0x49b   :  { %1643 = vmatprep.mubr.msk.bf16.mxu1 %vm1833_vm0, %v1832_v0  ;;  %1634 = vmatpush3.bf16.msra.mxu0 %v1702_v8 }
 0x49c   :  { %1647 = vmatprep.subr.bf16.mxu0 %v1832_v0 }
 0x502   :  { %v798_v34 = vpop.f32.mrb[24].mxu1 }
 0x503   :  { %v1593_v35 = vpop.f32.mrb[25].mxu1 }
 0x504   :  { %v749_v37 = vpop.f32.mrb[12].mxu0  ;;  %v801_v38 = vpop.f32.mrb[26].mxu1 }
 0x505   :  { %v1587_v40 = vpop.f32.mrb[13].mxu0  ;;  %v1594_v41 = vpop.f32.mrb[27].mxu1 }
 0x506   :  { %v752_v48 = vpop.f32.mrb[14].mxu0 }
 0x507   :  { %v1588_v49 = vpop.f32.mrb[15].mxu0 }
 0x50a   :  { %v896_v42 = vpop.f32.mrb[28].mxu1 }
 0x50b   :  { %v1605_v43 = vpop.f32.mrb[29].mxu1 }
 0x50c   :  { %v847_v44 = vpop.f32.mrb[16].mxu0  ;;  %v899_v45 = vpop.f32.mrb[30].mxu1 }
 0x50d   :  { %v1599_v46 = vpop.f32.mrb[17].mxu0  ;;  %v1606_v47 = vpop.f32.mrb[31].mxu1 }
 0x50e   :  { %v850_v50 = vpop.f32.mrb[18].mxu0 }
 0x50f   :  { %v1600_v51 = vpop.f32.mrb[19].mxu0 }
 0x510   :  { %v1703_v51 = vld [vmem:[#allocation5 + $0x10] sm:$0xff]  }
 0x511   :  { %1640 = vmatpush3.bf16.msra.mxu1 %v1703_v51 }
 0x512   :  { %1641 = vmatprep.subr.bf16.mxu1 %v1832_v0 }
 0x561   :  { %v945_v53 = vpop.f32.mrb[20].mxu0 }
 0x562   :  { %v1611_v54 = vpop.f32.mrb[21].mxu0 }
 0x563   :  { %v948_v55 = vpop.f32.mrb[22].mxu0 }
 0x564   :  { %v1612_v56 = vpop.f32.mrb[23].mxu0 }
 0x565   :  { %v994_v57 = vpop.f32.mrb[32].mxu1 }
 0x566   :  { %v1684_v58 = vpack.i.bf16 %v994_v57, %v798_v34  ;;  %v1617_v60 = vpop.f32.mrb[33].mxu1  ;;  %v1224_v57 = vsub.s32 2, %v1912_v7 }
 0x567   :  { %v997_v61 = vpop.f32.mrb[34].mxu1  ;;  %v1230_v60 = vsub.s32 3, %v1912_v7 }
 0x568   :  { %1685 = vrot.lane.b32.xlu0 %v1684_v58, %s1828_s26  ;;  %v1618_v63 = vpop.f32.mrb[35].mxu1  ;;  %v1225_v58 = vrot.slane %v1920_v9, %v1224_v57 }
 0x569   :  { %v1043_v62 = vpop.f32.mrb[24].mxu0 }
 0x56a   :  { %v1689_v59 = vpack.i.bf16 %v1043_v62, %v847_v44  ;;  %v1623_v1 = vpop.f32.mrb[25].mxu0 }
 0x56b   :  { %v1046_v2 = vpop.f32.mrb[26].mxu0 }
 0x56c   :  { %1690 = vrot.lane.b32.xlu1 %v1689_v59, %s1838_s1  ;;  %v1624_v5 = vpop.f32.mrb[27].mxu0  ;;  %v1231_v2 = vrot.slane %v1920_v9, %v1230_v60 }
 0x56d   :  { %v1092_v6 = vpop.f32.mrb[36].mxu1 }
 0x56e   :  { %v1694_v11 = vpack.i.bf16 %v1092_v6, %v896_v42  ;;  %v1629_v12 = vpop.f32.mrb[37].mxu1 }
 0x56f   :  { %v1095_v13 = vpop.f32.mrb[38].mxu1 }
 0x570   :  { %1695 = vrot.lane.b32.xlu0 %v1694_v11, %s1839_s27  ;;  %v1630_v14 = vpop.f32.mrb[39].mxu1  ;;  %v1705_v13 = vld [vmem:[#allocation5 + $0x20] sm:$0xff]  }
 0x571   :  { %v1706_v14 = vld [vmem:[#allocation5 + $0x28] sm:$0xff]  }
 0x5da   :  { %v1686_v15 = vpop.permute.xlu0 %1685 }
 0x5db   :  { %v1688_v18 = vunpack.i.h.bf16 %v1686_v15  ;;  %v1687_v19 = vunpack.i.l.bf16 %v1686_v15  ;;  %v1707_v15 = vld [vmem:[#allocation5 + $0x30] sm:$0xff]  }
 0x5dd   :  { %v1110_v39 = vsel %vm240_vm3, %v749_v37, %v1687_v19  ;;  %v1127_v23 = vsel %vm240_vm3, %v945_v53, %v1688_v18  ;;  %v1293_v18 = vsub.s32 4, %v1912_v7 }
 0x5de   :  { %v1691_v17 = vpop.permute.xlu1 %1690 }
 0x5df   :  { %v1693_v20 = vunpack.i.h.bf16 %v1691_v17  ;;  %v1692_v36 = vunpack.i.l.bf16 %v1691_v17  ;;  %v1708_v17 = vld [vmem:[#allocation5 + $0x38] sm:$0xff]   ;;  %v1294_v19 = vrot.slane %v1920_v9, %v1293_v18 }
 0x5e1   :  { %v1128_v10 = vsel %vm1111_vm4, %v1127_v23, %v1693_v20  ;;  %v1112_v24 = vsel %vm1111_vm4, %v1110_v39, %v1692_v36 }
 0x5e2   :  { %v1696_v21 = vpop.permute.xlu0 %1695 }
 0x5e3   :  { %v1698_v31 = vunpack.i.h.bf16 %v1696_v21  ;;  %v1697_v16 = vunpack.i.l.bf16 %v1696_v21 }
 0x5e5   :  { %v1114_v22 = vsel %vm1113_vm5, %v1112_v24, %v1697_v16  ;;  %v1129_v25 = vsel %vm1113_vm5, %v1128_v10, %v1698_v31 }
 0x5e6   :  { %v1130_v26 = vpack.c.bf16 %v1129_v25, %v1114_v22 }
 0x5e8   :  { %1636 = vmatmul.mubr.msk.bf16.vlgmr.msra.gmra.mrb[28].mxu0 %vm89_vm1, %v1130_v26 }
 0x5e9   :  { %1655 = vmatprep.mubr.msk.bf16.mxu0 %vm1833_vm0, %v1832_v0  ;;  %1648 = vmatpush3.bf16.msra.mxu0 %v1705_v13 }
 0x5ea   :  { %1649 = vmatprep.subr.bf16.mxu0 %v1832_v0 }
 0x5ed   :  { %1650 = vmatpush3.bf16.msra.mxu0 %v1706_v14 }
 0x5ee   :  { %1651 = vmatprep.subr.bf16.mxu0 %v1832_v0 }
 0x5f1   :  { %1652 = vmatpush3.bf16.msra.mxu0 %v1707_v15 }
 0x5f2   :  { %1653 = vmatprep.subr.bf16.mxu0 %v1832_v0 }
 0x5f5   :  { %1654 = vmatpush3.bf16.msra.mxu0 %v1708_v17 }
 0x6bb   :  { %v1180_v29 = vpop.f32.mrb[28].mxu0 }
 0x6bc   :  { %v1191_v30 = vadd.f32 %v1190_v28, %v1180_v29  ;;  %v1637_v32 = vpop.f32.mrb[29].mxu0 }
 0x6bd   :  { %v1183_v33 = vpop.f32.mrb[30].mxu0 }
 0x6be   :  { %v1192_v34 = vadd.f32 %v1190_v28, %v1183_v33  ;;  %v1638_v35 = vpop.f32.mrb[31].mxu0  ;;  %v1193_v37 = vadd.f32 %v1191_v30, %v1901_v3 }
 0x6c0   :  { %v1195_v38 = vsel %vm89_vm1, %v1193_v37, 0.0  ;;  %v1194_v40 = vadd.f32 %v1192_v34, %v1903_v4  ;;  %v1704_v4 = vld [vmem:[#allocation5 + $0x18] sm:$0xff]  }
 0x6c1   :  { %1196 = vadd.xlane.f32.xlu1 %v1195_v38  ;;  %1642 = vmatpush3.bf16.msra.mxu1 %v1704_v4 }
 0x6c2   :  { %v1198_v41 = vsel %vm89_vm1, %v1194_v40, 0.0 }
 0x6c3   :  { %1199 = vadd.xlane.f32.xlu0 %v1198_v41 }
 0x74e   :  { %v1197_v48 = vpop.xlane.xlu1 %1196 }
 0x74f   :  { %v1202_v49 = vmul.f32 0.03125, %v1197_v48  ;;  %v1387_v48 = vsub.s32 5, %v1912_v7 }
 0x750   :  { %v1200_v42 = vpop.xlane.xlu0 %1199 }
 0x751   :  { %v1204_v43 = vsub.f32 %v1193_v37, %v1202_v49  ;;  %v1203_v44 = vmul.f32 0.03125, %v1200_v42  ;;  %v1388_v49 = vrot.slane %v1920_v9, %v1387_v48 }
 0x753   :  { %v1205_v45 = vsub.f32 %v1194_v40, %v1203_v44  ;;  %v1206_v46 = vmul.f32 %v1204_v43, %v1204_v43 }
 0x755   :  { %v1208_v47 = vsel %vm89_vm1, %v1206_v46, 0.0  ;;  %v1207_v50 = vmul.f32 %v1205_v45, %v1205_v45 }
 0x756   :  { %1209 = vadd.xlane.f32.xlu0 %v1208_v47 }
 0x757   :  { %v1211_v3 = vsel %vm89_vm1, %v1207_v50, 0.0 }
 0x758   :  { %1212 = vadd.xlane.f32.xlu1 %v1211_v3 }
 0x7e3   :  { %v1210_v52 = vpop.xlane.xlu0 %1209 }
 0x7e4   :  { %v1214_v53 = vmul.f32 0.03125, %v1210_v52 }
 0x7e5   :  { %v1213_v54 = vpop.xlane.xlu1 %1212 }
 0x7e6   :  { %v1216_v55 = vadd.f32 1e-12, %v1214_v53  ;;  %v1215_v56 = vmul.f32 0.03125, %v1213_v54 }
 0x7e8   :  { %1741 = vrsqrt.f32 %v1216_v55  ;;  %v1217_v8 = vadd.f32 1e-12, %v1215_v56 }
 0x7ea   :  { %1743 = vrsqrt.f32 %v1217_v8 }
 0x7f2   :  { %v1742_v61 = vpop.eup %1741 }
 0x7f3   :  { %v1220_v63 = vmul.f32 %v1742_v61, %v1204_v43 }
 0x7f4   :  { %v1744_v62 = vpop.eup %1743 }
 0x7f5   :  { %v1226_v59 = vmul.f32 %v1225_v58, %v1220_v63  ;;  %v1221_v1 = vmul.f32 %v1744_v62, %v1205_v45 }
 0x7f7   :  { %v1227_v5 = vmul.f32 %v1225_v58, %v1221_v1  ;;  %v1232_v6 = vadd.f32 %v1231_v2, %v1226_v59 }
 0x7f9   :  { %v1233_v11 = vadd.f32 %v1231_v2, %v1227_v5  ;;  %v1421_v5 = vsub.s32 6, %v1912_v7 }
 0x7fb   :  { %v1234_v12 = vpack.c.bf16 %v1233_v11, %v1232_v6 }
 0x7fd   :  { %1644 = vmatmul.mubr.msk.bf16.vlgmr.msra.gmra.mrb[40].mxu1 %vm89_vm1, %v1234_v12 }
 0x8d0   :  { %v1284_v20 = vpop.f32.mrb[40].mxu1 }
 0x8d1   :  { %v1295_v36 = vadd.f32 %v1294_v19, %v1284_v20  ;;  %v1645_v21 = vpop.f32.mrb[41].mxu1 }
 0x8d2   :  { %v1287_v39 = vpop.f32.mrb[42].mxu1 }
 0x8d3   :  { %v1299_v23 = vmul.f32 0.044715, %v1295_v36  ;;  %v1296_v31 = vadd.f32 %v1294_v19, %v1287_v39  ;;  %v1646_v16 = vpop.f32.mrb[43].mxu1  ;;  %v1297_v34 = vmul.f32 0.5, %v1295_v36 }
 0x8d5   :  { %v1301_v10 = vmul.f32 %v1299_v23, %v1295_v36  ;;  %v1300_v24 = vmul.f32 0.044715, %v1296_v31  ;;  %v1298_v35 = vmul.f32 0.5, %v1296_v31 }
 0x8d7   :  { %v1303_v22 = vmul.f32 %v1301_v10, %v1295_v36  ;;  %v1302_v25 = vmul.f32 %v1300_v24, %v1296_v31 }
 0x8d9   :  { %v1305_v26 = vadd.f32 %v1303_v22, %v1295_v36  ;;  %v1304_v27 = vmul.f32 %v1302_v25, %v1296_v31 }
 0x8db   :  { %v1307_v28 = vmul.f32 0.7978846, %v1305_v26  ;;  %v1306_v0 = vadd.f32 %v1304_v27, %v1296_v31 }
 0x8dd   :  { %1745 = vtanh.f32 %v1307_v28  ;;  %v1308_v29 = vmul.f32 0.7978846, %v1306_v0 }
 0x8df   :  { %1747 = vtanh.f32 %v1308_v29 }
 0x8e7   :  { %v1746_v30 = vpop.eup %1745 }
 0x8e8   :  { %v1311_v32 = vadd.f32 1.0, %v1746_v30 }
 0x8e9   :  { %v1748_v33 = vpop.eup %1747 }
 0x8ea   :  { %v1312_v37 = vadd.f32 1.0, %v1748_v33  ;;  %v1313_v38 = vmul.f32 %v1311_v32, %v1297_v34 }
 0x8ec   :  { %v1314_v40 = vmul.f32 %v1312_v37, %v1298_v35 }
 0x8ee   :  { %v1315_v41 = vpack.c.bf16 %v1314_v40, %v1313_v38 }
 0x8f0   :  { %1656 = vmatmul.mubr.msk.bf16.vlgmr.msra.gmra.mrb[32].mxu0 %vm1340_vm6, %v1315_v41 }
 0x9c3   :  { %v1378_v42 = vpop.f32.mrb[32].mxu0 }
 0x9c4   :  { %v1389_v43 = vadd.f32 %v1388_v49, %v1378_v42  ;;  %v1657_v44 = vpop.f32.mrb[33].mxu0 }
 0x9c5   :  { %v1381_v45 = vpop.f32.mrb[34].mxu0 }
 0x9c6   :  { %v1390_v46 = vadd.f32 %v1388_v49, %v1381_v45  ;;  %v1658_v47 = vpop.f32.mrb[35].mxu0  ;;  %v1391_v50 = vadd.f32 %v1389_v43, %v1232_v6  ;;  %v1427_v6 = vsub.s32 7, %v1912_v7 }
 0x9c8   :  { %v1393_v3 = vsel %vm89_vm1, %v1391_v50, 0.0  ;;  %v1392_v51 = vadd.f32 %v1390_v46, %v1233_v11  ;;  %v1753_v11 = vld [vmem:[%s2166_s3] sm:$0xff] }
 0x9c9   :  { %1394 = vadd.xlane.f32.xlu0 %v1393_v3  ;;  %v1422_v12 = vrot.slane %v1753_v11, %v1421_v5  ;;  %v1428_v15 = vrot.slane %v1753_v11, %v1427_v6 }
 0x9ca   :  { %v1396_v4 = vsel %vm89_vm1, %v1392_v51, 0.0 }
 0x9cb   :  { %1397 = vadd.xlane.f32.xlu1 %v1396_v4 }
 0xa56   :  { %v1395_v52 = vpop.xlane.xlu0 %1394 }
 0xa57   :  { %v1399_v53 = vmul.f32 0.03125, %v1395_v52 }
 0xa58   :  { %v1398_v54 = vpop.xlane.xlu1 %1397 }
 0xa59   :  { %v1401_v55 = vsub.f32 %v1391_v50, %v1399_v53  ;;  %v1400_v56 = vmul.f32 0.03125, %v1398_v54 }
 0xa5b   :  { %v1402_v9 = vsub.f32 %v1392_v51, %v1400_v56  ;;  %v1403_v8 = vmul.f32 %v1401_v55, %v1401_v55 }
 0xa5d   :  { %v1405_v57 = vsel %vm89_vm1, %v1403_v8, 0.0  ;;  %v1404_v58 = vmul.f32 %v1402_v9, %v1402_v9 }
 0xa5e   :  { %1406 = vadd.xlane.f32.xlu0 %v1405_v57 }
 0xa5f   :  { %v1408_v60 = vsel %vm89_vm1, %v1404_v58, 0.0 }
 0xa60   :  { %1409 = vadd.xlane.f32.xlu1 %v1408_v60 }
 0xaeb   :  { %v1407_v61 = vpop.xlane.xlu0 %1406 }
 0xaec   :  { %v1411_v63 = vmul.f32 0.03125, %v1407_v61 }
 0xaed   :  { %v1410_v62 = vpop.xlane.xlu1 %1409 }
 0xaee   :  { %v1413_v59 = vadd.f32 1e-12, %v1411_v63  ;;  %v1412_v1 = vmul.f32 0.03125, %v1410_v62 }
 0xaf0   :  { %1749 = vrsqrt.f32 %v1413_v59  ;;  %v1414_v2 = vadd.f32 1e-12, %v1412_v1 }
 0xaf2   :  { %1751 = vrsqrt.f32 %v1414_v2 }
 0xafa   :  { %v1750_v13 = vpop.eup %1749 }
 0xafb   :  { %v1417_v14 = vmul.f32 %v1750_v13, %v1401_v55 }
 0xafc   :  { %v1752_v17 = vpop.eup %1751 }
 0xafd   :  { %v1418_v18 = vmul.f32 %v1752_v17, %v1402_v9  ;;  %v1423_v19 = vmul.f32 %v1422_v12, %v1417_v14 }
 0xaff   :  { %v1424_v20 = vmul.f32 %v1422_v12, %v1418_v18  ;;  %v1429_v36 = vadd.f32 %v1428_v15, %v1423_v19 }
 0xb01   :  { %v1430_v21 = vadd.f32 %v1428_v15, %v1424_v20  ;;  %1431 = vst.msk [vmem:[#allocation7] sm:$0xff] %vm89_vm1, %v1429_v36 }
 0xb03   :  { %1432 = vst.msk [vmem:[#allocation7 + $0x8] sm:$0xff] %vm89_vm1, %v1430_v21 }
 0xb04   :  { %1809 = shalt.err (!%p1806_p6)
}
 0xb05   :  { %s1810_s8 = scalar_lea.hbm %s2167_s4, 256 }
 0xb06   :  { %p1811_p7 = scmp.ne.s32.totalorder %s2167_s4, %s1810_s8  ;;  %p1814_p8 = scmp.lt.u32.totalorder %s1810_s8, %s2167_s4 }
 0xb08   :  { %p1816_p9 = pnand %p1814_p8, %p1811_p7 }
 0xb0a   :  { %1819 = shalt.err (!%p1816_p9)
}
 0xb0b   :  { %1444 = dma.vmem_to_hbm [thread:$0]  %s1439_s5, 256, %s2167_s4, [#allocation4], %s1827_s25, %s1827_s25, %s1828_s26  }
 0xb0c   :  { %1824 = dma.done.wait [#allocation4], 256  }
 0xb0d   :  { %1825 = vsyncadd [#allocation4], 4294967040 }
 0xb0e   :  { %1448 = vsyncpa [#allocation3], 1 }
 0xb0f   :  { %1449 = vsyncpa [#allocation6], 1 }
 0xb10   :  { %1450 = vsyncpa [#allocation4], 1 }

</bundles_post_ra>
